<compile_context>
chip_gen: v5e
topology: v5e:2x2
jax: 0.10.0
libtpu: 0.0.40
codegen_flags: <defaults>
</compile_context>

<pallas_src>
import functools

import jax
import jax.numpy as jnp
from jax.experimental import pallas as pl
from jax.experimental.pallas import tpu as pltpu

EPS = 1e-5
BN_SCALE = 1.0 / (1.0 + EPS) ** 0.5  # gamma=1, beta=0, mean=0, var=1


# ----------------------------------------------------------------------------
# Tap decomposition helpers (pure Python metadata + cheap XLA reshapes/pads)
# ----------------------------------------------------------------------------
def _conv_taps(kh, kw, stride, pad, wo):
    """Decompose a (kh,kw,stride,pad) conv into flat-row-offset taps.

    Returns (phases, taps); taps[t] = (phase_pos, flat_row_offset, col_mask)
    in (i, j) row-major order, matching w.reshape(kh*kw*cin, cout)."""
    raw = []
    for i in range(kh):
        for j in range(kw):
            tr, tc = i - pad, j - pad
            if stride == 1:
                ph, dh, dw = (0, 0), tr, tc
            else:  # stride 2: tap lands on phase (tr%2, tc%2) at offset (tr//2, tc//2)
                ph, dh, dw = (tr % 2, tc % 2), tr // 2, tc // 2
            mask = None if dw == 0 else (max(0, -dw), wo - max(0, dw))
            raw.append((ph, dh * wo + dw, mask))
    phases = sorted({ph for ph, _, _ in raw})
    return phases, [(phases.index(ph), off, m) for ph, off, m in raw]


def _phase_flat(x, stride, ph):
    n, h, w, c = x.shape
    if stride == 1:
        return x.reshape(n, h * w, c)
    a, b = ph
    return x[:, a::2, b::2, :].reshape(n, (h // 2) * (w // 2), c)


def _build_col_masks(taps, rows, out_w):
    """Hoisted boolean column masks, shared across taps with the same range."""
    ranges = sorted({m for _, _, m in taps if m is not None})
    if not ranges:
        return {}
    col = jax.lax.broadcasted_iota(jnp.int32, (rows, 1), 0) % out_w
    return {rng: (col >= rng[0]) & (col < rng[1]) for rng in ranges}


# ----------------------------------------------------------------------------
# Fused conv (tap-matmul) + folded-BN bias + optional residual + ReLU kernel
# ----------------------------------------------------------------------------
def _fused_conv_kernel(*refs, n_src, taps, cin, rows, out_w, relu, has_residual):
    srcs = refs[:n_src]
    w_ref = refs[n_src]
    b_ref = refs[n_src + 1]
    r_ref = refs[n_src + 2] if has_residual else None
    o_ref = refs[-1]
    tn = o_ref.shape[-1]

    col_masks = _build_col_masks(taps, rows, out_w)

    # Bias folded into the accumulator init (one fewer epilogue pass).
    acc = jnp.broadcast_to(b_ref[...], (rows, tn)).astype(jnp.float32)
    for t, (s, start, mask) in enumerate(taps):
        lhs = srcs[s][0, pl.ds(start, rows), :]
        if mask is not None:
            lhs = jnp.where(col_masks[mask], lhs, 0)
        acc = acc + jnp.dot(lhs, w_ref[pl.ds(t * cin, cin), :],
                            preferred_element_type=jnp.float32)

    out = acc
    if has_residual:
        out = out + r_ref[0].astype(jnp.float32)
    if relu:
        out = jnp.maximum(out, 0.0)
    o_ref[0] = out.astype(o_ref.dtype)


def fused_conv(x, w, bias, *, stride, pad, residual=None, relu=True):
    """relu?( conv(x, w, stride, pad) + bias (+ residual) ); BN pre-folded.

    x: [N,H,W,Cin] float, w: [kh,kw,Cin,Cout] f32, bias: [Cout] f32.
    Returns [N,Ho,Wo,Cout] bf16."""
    N, H, W, Cin = x.shape
    kh, kw, _, Cout = w.shape
    Ho = (H + 2 * pad - kh) // stride + 1
    Wo = (W + 2 * pad - kw) // stride + 1
    M = Ho * Wo

    if Cin == 1:
        # 1-channel stem conv: tiny im2col (K = kh*kw) is the natural GEMM.
        xp = jnp.pad(x, ((0, 0), (pad, pad), (pad, pad), (0, 0)))
        cols = [xp[:, i:i + stride * Ho:stride, j:j + stride * Wo:stride, 0]
                for i in range(kh) for j in range(kw)]
        srcs = [jnp.stack(cols, axis=-1).reshape(N, M, kh * kw)
                .astype(jnp.bfloat16)]
        taps = ((0, 0, None),)
        cin_tap = kh * kw
    else:
        if stride == 1:
            assert Ho == H and Wo == W, "stride-1 conv must preserve shape"
        else:
            assert stride == 2 and H % 2 == 0 and W % 2 == 0
            assert Ho == H // 2 and Wo == W // 2
        phases, raw = _conv_taps(kh, kw, stride, pad, Wo)
        offs = [o for _, o, _ in raw]
        front, back = max(0, -min(offs)), max(0, max(offs))
        srcs = [jnp.pad(_phase_flat(x, stride, ph),
                        ((0, 0), (front, back), (0, 0))).astype(jnp.bfloat16)
                for ph in phases]
        taps = tuple((s, o + front, m) for s, o, m in raw)
        cin_tap = Cin

    R = srcs[0].shape[1]
    src_c = srcs[0].shape[-1]
    K = kh * kw * Cin
    w_mat = w.reshape(K, Cout).astype(jnp.bfloat16)
    bias2 = bias.reshape(1, Cout).astype(jnp.float32)
    tn = Cout if Cout <= 256 else 256   # 256-wide lanes for the 512ch stage

    has_res = residual is not None
    args = list(srcs) + [w_mat, bias2]
    in_specs = ([pl.BlockSpec((1, R, src_c), lambda j, n: (n, 0, 0))
                 for _ in srcs]
                + [pl.BlockSpec((K, tn), lambda j, n: (0, j)),
                   pl.BlockSpec((1, tn), lambda j, n: (0, j))])
    if has_res:
        args.append(residual.reshape(N, M, Cout).astype(jnp.bfloat16))
        in_specs.append(pl.BlockSpec((1, M, tn), lambda j, n: (n, 0, j)))

    kernel = functools.partial(
        _fused_conv_kernel, n_src=len(srcs), taps=taps, cin=cin_tap, rows=M,
        out_w=Wo, relu=relu, has_residual=has_res)

    out = pl.pallas_call(
        kernel,
        out_shape=jax.ShapeDtypeStruct((N, M, Cout), jnp.bfloat16),
        grid_spec=pltpu.PrefetchScalarGridSpec(
            num_scalar_prefetch=0,
            # Cout tiles outer, batch inner: the weight block index does not
            # change over the inner loop (weight-stationary reuse).
            grid=(Cout // tn, N),
            in_specs=in_specs,
            out_specs=pl.BlockSpec((1, M, tn), lambda j, n: (n, 0, j)),
        ),
        compiler_params=pltpu.CompilerParams(
            dimension_semantics=("parallel", "parallel")),
    )(*args)
    return out.reshape(N, Ho, Wo, Cout)


# ----------------------------------------------------------------------------
# MaxPool2d(kernel=3, stride=2, padding=1): elementwise max over 9 flat taps
# ----------------------------------------------------------------------------
def _maxpool_kernel(*refs, n_src, taps, rows, out_w):
    srcs = refs[:n_src]
    o_ref = refs[-1]
    c = o_ref.shape[-1]
    neg = jnp.float32(jnp.finfo(jnp.float32).min)
    col_masks = _build_col_masks(taps, rows, out_w)
    acc = jnp.full((rows, c), neg, jnp.float32)
    for s, start, mask in taps:
        v = srcs[s][0, pl.ds(start, rows), :].astype(jnp.float32)
        if mask is not None:
            v = jnp.where(col_masks[mask], v, neg)
        acc = jnp.maximum(acc, v)
    o_ref[0] = acc.astype(o_ref.dtype)


def maxpool_3x3_s2(x):
    N, H, W, C = x.shape
    Ho, Wo = H // 2, W // 2
    M = Ho * Wo
    phases, raw = _conv_taps(3, 3, 2, 1, Wo)
    offs = [o for _, o, _ in raw]
    front, back = max(0, -min(offs)), max(0, max(offs))
    neg = float(jnp.finfo(jnp.bfloat16).min)
    srcs = [jnp.pad(_phase_flat(x, 2, ph).astype(jnp.bfloat16),
                    ((0, 0), (front, back), (0, 0)), constant_values=neg)
            for ph in phases]
    taps = tuple((s, o + front, m) for s, o, m in raw)
    R = M + front + back

    kernel = functools.partial(_maxpool_kernel, n_src=len(srcs), taps=taps,
                               rows=M, out_w=Wo)
    out = pl.pallas_call(
        kernel,
        out_shape=jax.ShapeDtypeStruct((N, M, C), jnp.bfloat16),
        grid_spec=pltpu.PrefetchScalarGridSpec(
            num_scalar_prefetch=0,
            grid=(N,),
            in_specs=[pl.BlockSpec((1, R, C), lambda n: (n, 0, 0))
                      for _ in srcs],
            out_specs=pl.BlockSpec((1, M, C), lambda n: (n, 0, 0)),
        ),
        compiler_params=pltpu.CompilerParams(dimension_semantics=("parallel",)),
    )(*srcs)
    return out.reshape(N, Ho, Wo, C)


# ----------------------------------------------------------------------------
# Parameter init (kaiming-normal fan_out) with identity-BN folded into w / b
# ----------------------------------------------------------------------------
def _kaiming_out(key, kh, kw, cin, cout):
    fan_out = cout * kh * kw
    std = (2.0 / fan_out) ** 0.5
    return jax.random.normal(key, (kh, kw, cin, cout), jnp.float32) * std


def _conv_bias(key, kh, kw, cin, cout):
    fan_in = cin * kh * kw
    bound = 1.0 / (fan_in ** 0.5)
    return jax.random.uniform(key, (cout,), jnp.float32, -bound, bound)


def init_params(key, layers=(2, 2, 2, 2)):
    keys = iter(jax.random.split(key, 512))
    params = {
        "conv1_w": _kaiming_out(next(keys), 7, 7, 1, 64) * BN_SCALE,
        "conv1_b": jnp.zeros((64,), jnp.float32),  # conv1 bias=False, BN beta=0
    }
    inplanes = 64
    all_layers = []
    for planes, stride, nblocks in zip((64, 128, 256, 512), (1, 2, 2, 2), layers):
        layer = []
        for b in range(nblocks):
            s = stride if b == 0 else 1
            blk = {
                "stride": s,
                "conv1_w": _kaiming_out(next(keys), 3, 3, inplanes, planes) * BN_SCALE,
                "conv1_b": _conv_bias(next(keys), 3, 3, inplanes, planes) * BN_SCALE,
                "conv2_w": _kaiming_out(next(keys), 3, 3, planes, planes) * BN_SCALE,
                "conv2_b": _conv_bias(next(keys), 3, 3, planes, planes) * BN_SCALE,
            }
            if s != 1 or inplanes != planes:
                blk["down_w"] = _kaiming_out(next(keys), 1, 1, inplanes, planes) * BN_SCALE
                blk["down_b"] = _conv_bias(next(keys), 1, 1, inplanes, planes) * BN_SCALE
            layer.append(blk)
            inplanes = planes
        all_layers.append(layer)
    params["layers"] = all_layers
    return params


# ----------------------------------------------------------------------------
# Forward pass
# ----------------------------------------------------------------------------
def basic_block(blk, x):
    s = blk["stride"]
    out = fused_conv(x, blk["conv1_w"], blk["conv1_b"],
                     stride=s, pad=1, relu=True)
    if "down_w" in blk:
        identity = fused_conv(x, blk["down_w"], blk["down_b"],
                              stride=s, pad=0, relu=False)
    else:
        identity = x
    return fused_conv(out, blk["conv2_w"], blk["conv2_b"],
                      stride=1, pad=1, residual=identity, relu=True)


def resnet_forward(params, x_nchw):
    """x_nchw: [N, 1, H, W]  ->  (x1, x2, x3, x4, x5) in NCHW float32."""
    x = jnp.transpose(x_nchw, (0, 2, 3, 1)).astype(jnp.bfloat16)

    # conv1 (7x7, s=2, p=3, bias=False) + folded bn1 + relu
    x1 = fused_conv(x, params["conv1_w"], params["conv1_b"],
                    stride=2, pad=3, relu=True)
    out = maxpool_3x3_s2(x1)

    stage_outs = []
    for layer in params["layers"]:
        for blk in layer:
            out = basic_block(blk, out)
        stage_outs.append(out)
    x2, x3, x4, x5 = stage_outs

    to_nchw = lambda a: jnp.transpose(a, (0, 3, 1, 2)).astype(jnp.float32)
    return tuple(to_nchw(a) for a in (x1, x2, x3, x4, x5))


if __name__ == "__main__":
    key = jax.random.PRNGKey(0)
    pkey, xkey = jax.random.split(key)
    params = init_params(pkey, layers=(2, 2, 2, 2))

    # small input: batch=2, 1 channel (conv1 expects 1), 64x64 spatial
    x = jax.random.normal(xkey, (2, 1, 64, 64), jnp.float32)

    outs = resnet_forward(params, x)
    outs = jax.block_until_ready(outs)

    expected = [(2, 64, 32, 32), (2, 64, 16, 16), (2, 128, 8, 8),
                (2, 256, 4, 4), (2, 512, 2, 2)]
    assert [o.shape for o in outs] == expected
    assert all(bool(jnp.all(jnp.isfinite(o))) for o in outs)
    print("KERNEL_OK")
</pallas_src>

<mosaic_0001>
module attributes {stable_mosaic.version = 11 : i64} {
  func.func @_fused_conv_kernel(%arg0: i32, %arg1: i32, %arg2: memref<1x1024x49xbf16, #tpu.memory_space<vmem>>, %arg3: memref<49x64xbf16, #tpu.memory_space<vmem>>, %arg4: memref<1x64xf32, #tpu.memory_space<vmem>>, %arg5: memref<1x1024x64xbf16, #tpu.memory_space<vmem>>) attributes {dimension_semantics = [#tpu.dimension_semantics<parallel>, #tpu.dimension_semantics<parallel>], iteration_bounds = array<i64: 1, 2>, scalar_prefetch = 0 : i64, scratch_operands = 0 : i64, tpu.core_type = #tpu.core_type<tc>, window_params = [{transform_indices = @transform_0, window_bounds = array<i64: 1, 1024, 49>}, {transform_indices = @transform_1, window_bounds = array<i64: 49, 64>}, {transform_indices = @transform_2, window_bounds = array<i64: 1, 64>}, {transform_indices = @transform_3, window_bounds = array<i64: 1, 1024, 64>}]} {
    %c0 = arith.constant 0 : index
    %c0_0 = arith.constant 0 : index
    %0 = vector.load %arg4[%c0, %c0_0] : memref<1x64xf32, #tpu.memory_space<vmem>>, vector<1x64xf32>
    %1 = vector.shape_cast %0 : vector<1x64xf32> to vector<1x64xf32>
    %2 = vector.broadcast %1 : vector<1x64xf32> to vector<1024x64xf32>
    %c0_1 = arith.constant 0 : index
    %c0_2 = arith.constant 0 : index
    %c0_3 = arith.constant 0 : index
    %3 = vector.load %arg2[%c0_1, %c0_2, %c0_3] : memref<1x1024x49xbf16, #tpu.memory_space<vmem>>, vector<1x1024x49xbf16>
    %4 = vector.shape_cast %3 : vector<1x1024x49xbf16> to vector<1024x49xbf16>
    %c0_4 = arith.constant 0 : index
    %c0_5 = arith.constant 0 : index
    %5 = vector.load %arg3[%c0_4, %c0_5] : memref<49x64xbf16, #tpu.memory_space<vmem>>, vector<49x64xbf16>
    %cst = arith.constant dense<0.000000e+00> : vector<1024x64xf32>
    %6 = tpu.matmul %4, %5, %cst {dimension_numbers = #tpu.dot_dimension_numbers<[1], [0], [0], [1], [0, 0, 1, 1], [], []>} : vector<1024x49xbf16>, vector<49x64xbf16>, vector<1024x64xf32> -> vector<1024x64xf32>
    %7 = arith.addf %2, %6 : vector<1024x64xf32>
    %cst_6 = arith.constant 0.000000e+00 : f32
    %8 = vector.broadcast %cst_6 : f32 to vector<1024x64xf32>
    %9 = arith.maximumf %7, %8 : vector<1024x64xf32>
    %10 = arith.truncf %9 : vector<1024x64xf32> to vector<1024x64xbf16>
    %c0_7 = arith.constant 0 : index
    %c0_8 = arith.constant 0 : index
    %c0_9 = arith.constant 0 : index
    %11 = vector.load %arg5[%c0_7, %c0_8, %c0_9] : memref<1x1024x64xbf16, #tpu.memory_space<vmem>>, vector<1x1024x64xbf16>
    %12 = vector.shape_cast %11 : vector<1x1024x64xbf16> to vector<1024x64xbf16>
    %13 = vector.shape_cast %10 : vector<1024x64xbf16> to vector<1x1024x64xbf16>
    tpu.vector_store %arg5[%c0_7, %c0_8, %c0_9], %13 {strides = array<i32>} : memref<1x1024x64xbf16, #tpu.memory_space<vmem>>, vector<1x1024x64xbf16>,
    return
  }
  func.func @transform_0(%arg0: i32, %arg1: i32) -> (i32, i32, i32) {
    %c0_i32 = arith.constant 0 : i32
    %c0_i32_0 = arith.constant 0 : i32
    %c0_i32_1 = arith.constant 0 : i32
    return %arg1, %c0_i32, %c0_i32_0 : i32, i32, i32
  }
  func.func @transform_1(%arg0: i32, %arg1: i32) -> (i32, i32) {
    %c0_i32 = arith.constant 0 : i32
    %c0_i32_0 = arith.constant 0 : i32
    return %c0_i32, %arg0 : i32, i32
  }
  func.func @transform_2(%arg0: i32, %arg1: i32) -> (i32, i32) {
    %c0_i32 = arith.constant 0 : i32
    %c0_i32_0 = arith.constant 0 : i32
    return %c0_i32, %arg0 : i32, i32
  }
  func.func @transform_3(%arg0: i32, %arg1: i32) -> (i32, i32, i32) {
    %c0_i32 = arith.constant 0 : i32
    %c0_i32_0 = arith.constant 0 : i32
    return %arg1, %c0_i32, %arg0 : i32, i32, i32
  }
}

</mosaic_0001>

<bundles_post_ra>
// kernel: tpu_custom_call.1
= control target key start
LH: loop header
LB: loop body
LE: loop exit
PB: predicated region body
PF: predicated region fallthrough
CT: control target
= control target key end

     0   :  { %s2347_s12 = smov 0   ;;  %s2349_s13 = smov 0   ;;  %s2925_s0 = inlined_call_operand.vmem [shape: bf16[2,1024,49], index: 0, kind: input, shape index: {}]   ;;  %s2926_s1 = inlined_call_operand.vmem [shape: bf16[49,64], index: 1, kind: input, shape index: {}]   ;;  %s2927_s2 = inlined_call_operand.vmem [shape: f32[1,64], index: 2, kind: input, shape index: {}]   ;;  %s2928_s3 = inlined_call_operand.vmem [shape: bf16[2,1024,64], index: 3, kind: output, shape index: {}]  }
   0x1   :  { %s2351_s14 = smov 0  }
   0x2 LB: > { %s22_s15 = sadd.s32 1, %s2320_s13  ;;  %p1855_p0 = scmp.ge.s32.totalorder %s2324_s14, 1  ;;  %s2324_s14 = sphi %s2351_s14, %s13_s14   ;;  %s2320_s13 = sphi %s2349_s13, %s2930_s13   ;;  %s2316_s12 = sphi %s2347_s12, %s2929_s12  }
   0x3   : > { %p23_p1 = scmp.ge.s32.totalorder %s22_s15, 2  ;;  %p168_p2 = scmp.lt.s32.totalorder %s2324_s14, 3 }
   0x5   : > { %s2932_s15 = smov (%p23_p1, %s22_s15), 0  ;;  %p169_p3 = pnand %p1855_p0, %p168_p2 }
   0x6   : > { %p202_p4 = scmp.lt.s32.totalorder (!%p169_p3), %s2316_s12, 1 }
   0x7   : > { %172 = sbr.rel (%p169_p3) target bundleno = 423 (0x1a7), region = 32 }
   0xc   : > { %v361_v0 = vld [vmem:[%s2926_s1 + $0x18] sm:$0x1]  ;;  %vm896_vm0 = vcmask 1040384   ;;  %v2326_v2 = vmov 0   ;;  %v2262_v6 = vld [vmem:[%s2926_s1 + $0x10] sm:$0xff]  ;;  %s2934_s12 = smov (!%p202_p4, %s2316_s12), 1 }
   0xd   : > { %v695_v1 = vunpack.c.l.b16 %v361_v0  ;;  %v898_v3 = vsel %vm896_vm0, 65535, %v2326_v2  ;;  %v2261_v7 = vld [vmem:[%s2926_s1 + $0x8] sm:$0xff]  ;;  %s2194_s22 = sshll.u32 %s2934_s12, 9  ;;  %v2260_v8 = vld [vmem:[%s2926_s1] sm:$0xff]  ;;  %vm703_vm1 = vcmask 400384   ;;  %vm1615_vm2 = vcmask 519168  }
   0xe   : > { %s2385_s27 = scalar_lea.vmem %s2925_s0, %s2194_s22  ;;  %v2454_v41 = vld [vmem:[%s2927_s2] ss:$0 sm:$0xff]  ;;  %s2469_s5 = scalar_lea.vmem %s2928_s3, %s2194_s22 }
   0xf   : > { %v699_v4 = vpack.c.b16 %v695_v1, %v695_v1  ;;  %v2196_v9 = vld [vmem:[%s2385_s27] sm:$0xff]  ;;  %v2197_v13 = vld [vmem:[%s2385_s27 + $0x8] sm:$0xff]  ;;  %v2198_v17 = vld [vmem:[%s2385_s27 + $0x10] sm:$0xff] }
  0x10   : > { %v2212_v10 = vld [vmem:[%s2385_s27 + $0x80] sm:$0xff]  ;;  %v2213_v14 = vld [vmem:[%s2385_s27 + $0x88] sm:$0xff]  ;;  %v2214_v18 = vld [vmem:[%s2385_s27 + $0x90] sm:$0xff] }
  0x11   : > { %v900_v5 = vand.u32 %v898_v3, %v699_v4  ;;  %v2228_v11 = vld [vmem:[%s2385_s27 + $0x100] sm:$0xff]  ;;  %v2229_v15 = vld [vmem:[%s2385_s27 + $0x108] sm:$0xff]  ;;  %v2230_v19 = vld [vmem:[%s2385_s27 + $0x110] sm:$0xff] }
  0x12   : > { %v2244_v12 = vld [vmem:[%s2385_s27 + $0x180] sm:$0xff]  ;;  %v2245_v16 = vld [vmem:[%s2385_s27 + $0x188] sm:$0xff]  ;;  %v2246_v20 = vld [vmem:[%s2385_s27 + $0x190] sm:$0xff] }
  0x13   : > { %906 = vmatpush.bf16.msra.mxu0 %v900_v5  ;;  %2263 = vmatpush.bf16.msra.mxu1 %v900_v5  ;;  %v2199_v21 = vld [vmem:[%s2385_s27 + $0x18] sm:$0xff]  ;;  %v2200_v25 = vld [vmem:[%s2385_s27 + $0x20] sm:$0xff]  ;;  %v2201_v29 = vld [vmem:[%s2385_s27 + $0x28] sm:$0xff] }
  0x14   : > { %2264 = vmatpush.bf16.msra.mxu2 %v900_v5  ;;  %2265 = vmatpush.bf16.msra.mxu3 %v900_v5  ;;  %v2215_v22 = vld [vmem:[%s2385_s27 + $0x98] sm:$0xff]  ;;  %v2216_v26 = vld [vmem:[%s2385_s27 + $0xa0] sm:$0xff]  ;;  %v2217_v30 = vld [vmem:[%s2385_s27 + $0xa8] sm:$0xff] }
  0x15   : > { %v2231_v23 = vld [vmem:[%s2385_s27 + $0x118] sm:$0xff]  ;;  %v2232_v27 = vld [vmem:[%s2385_s27 + $0x120] sm:$0xff]  ;;  %v2233_v31 = vld [vmem:[%s2385_s27 + $0x128] sm:$0xff] }
  0x16   : > { %v2247_v24 = vld [vmem:[%s2385_s27 + $0x198] sm:$0xff]  ;;  %v2248_v28 = vld [vmem:[%s2385_s27 + $0x1a0] sm:$0xff]  ;;  %v2249_v32 = vld [vmem:[%s2385_s27 + $0x1a8] sm:$0xff] }
  0x17   : > { %907 = vmatpush.bf16.msra.mxu0 %v2262_v6  ;;  %2266 = vmatpush.bf16.msra.mxu1 %v2262_v6  ;;  %v2202_v33 = vld [vmem:[%s2385_s27 + $0x30] sm:$0xff]  ;;  %v2203_v37 = vld [vmem:[%s2385_s27 + $0x38] sm:$0xff]  ;;  %v2204_v42 = vld [vmem:[%s2385_s27 + $0x40] sm:$0xff] }
  0x18   : > { %2267 = vmatpush.bf16.msra.mxu2 %v2262_v6  ;;  %2268 = vmatpush.bf16.msra.mxu3 %v2262_v6  ;;  %v2218_v34 = vld [vmem:[%s2385_s27 + $0xb0] sm:$0xff]  ;;  %v2219_v38 = vld [vmem:[%s2385_s27 + $0xb8] sm:$0xff]  ;;  %v2220_v43 = vld [vmem:[%s2385_s27 + $0xc0] sm:$0xff] }
  0x19   : > { %v2234_v35 = vld [vmem:[%s2385_s27 + $0x130] sm:$0xff]  ;;  %v2235_v39 = vld [vmem:[%s2385_s27 + $0x138] sm:$0xff]  ;;  %v2236_v46 = vld [vmem:[%s2385_s27 + $0x140] sm:$0xff] }
  0x1a   : > { %v2250_v36 = vld [vmem:[%s2385_s27 + $0x1b0] sm:$0xff]  ;;  %v2251_v40 = vld [vmem:[%s2385_s27 + $0x1b8] sm:$0xff]  ;;  %v2252_v47 = vld [vmem:[%s2385_s27 + $0x1c0] sm:$0xff] }
  0x1b   : > { %908 = vmatpush.bf16.msra.mxu0 %v2261_v7  ;;  %2269 = vmatpush.bf16.msra.mxu1 %v2261_v7 }
  0x1c   : > { %2270 = vmatpush.bf16.msra.mxu2 %v2261_v7  ;;  %2271 = vmatpush.bf16.msra.mxu3 %v2261_v7 }
  0x1f   : > { %909 = vmatpush.bf16.msra.mxu0 %v2260_v8  ;;  %2272 = vmatpush.bf16.msra.mxu1 %v2260_v8 }
  0x20   : > { %2273 = vmatpush.bf16.msra.mxu2 %v2260_v8  ;;  %2274 = vmatpush.bf16.msra.mxu3 %v2260_v8  ;;  %v2205_v8 = vld [vmem:[%s2385_s27 + $0x48] sm:$0xff] }
  0x22   : > { %2128 = vmatmul.msk.bf16.vlgmr.msra.gmra.mxu0 %vm703_vm1, %v2196_v9  ;;  %2144 = vmatmul.msk.bf16.vlgmr.msra.gmra.mxu1 %vm703_vm1, %v2212_v10  ;;  %v2221_v9 = vld [vmem:[%s2385_s27 + $0xc8] sm:$0xff] }
  0x23   : > { %2160 = vmatmul.msk.bf16.vlgmr.msra.gmra.mxu2 %vm703_vm1, %v2228_v11  ;;  %2176 = vmatmul.msk.bf16.vlgmr.msra.gmra.mxu3 %vm703_vm1, %v2244_v12 }
  0x32   : > { %2129 = vmatmul.msk.bf16.gmra.mxu0 %vm703_vm1, %v2197_v13  ;;  %2145 = vmatmul.msk.bf16.gmra.mxu1 %vm703_vm1, %v2213_v14  ;;  %v2237_v14 = vld [vmem:[%s2385_s27 + $0x148] sm:$0xff] }
  0x33   : > { %2161 = vmatmul.msk.bf16.gmra.mxu2 %vm703_vm1, %v2229_v15  ;;  %2177 = vmatmul.msk.bf16.gmra.mxu3 %vm703_vm1, %v2245_v16  ;;  %v2253_v15 = vld [vmem:[%s2385_s27 + $0x1c8] sm:$0xff] }
  0x42   : > { %2130 = vmatmul.msk.bf16.gmra.mxu0 %vm703_vm1, %v2198_v17  ;;  %2146 = vmatmul.msk.bf16.gmra.mxu1 %vm703_vm1, %v2214_v18 }
  0x43   : > { %2162 = vmatmul.msk.bf16.gmra.mxu2 %vm703_vm1, %v2230_v19  ;;  %2178 = vmatmul.msk.bf16.gmra.mxu3 %vm703_vm1, %v2246_v20 }
  0x52   : > { %2131 = vmatmul.msk.bf16.gmra.mxu0 %vm703_vm1, %v2199_v21  ;;  %2147 = vmatmul.msk.bf16.gmra.mxu1 %vm703_vm1, %v2215_v22 }
  0x53   : > { %2163 = vmatmul.msk.bf16.gmra.mxu2 %vm703_vm1, %v2231_v23  ;;  %2179 = vmatmul.msk.bf16.gmra.mxu3 %vm703_vm1, %v2247_v24 }
  0x62   : > { %2132 = vmatmul.msk.bf16.gmra.mxu0 %vm703_vm1, %v2200_v25  ;;  %2148 = vmatmul.msk.bf16.gmra.mxu1 %vm703_vm1, %v2216_v26 }
  0x63   : > { %2164 = vmatmul.msk.bf16.gmra.mxu2 %vm703_vm1, %v2232_v27  ;;  %2180 = vmatmul.msk.bf16.gmra.mxu3 %vm703_vm1, %v2248_v28 }
  0x72   : > { %2133 = vmatmul.msk.bf16.gmra.mxu0 %vm703_vm1, %v2201_v29  ;;  %2149 = vmatmul.msk.bf16.gmra.mxu1 %vm703_vm1, %v2217_v30 }
  0x73   : > { %2165 = vmatmul.msk.bf16.gmra.mxu2 %vm703_vm1, %v2233_v31  ;;  %2181 = vmatmul.msk.bf16.gmra.mxu3 %vm703_vm1, %v2249_v32 }
  0x82   : > { %2134 = vmatmul.msk.bf16.gmra.mxu0 %vm703_vm1, %v2202_v33  ;;  %2150 = vmatmul.msk.bf16.gmra.mxu1 %vm703_vm1, %v2218_v34 }
  0x83   : > { %2166 = vmatmul.msk.bf16.gmra.mxu2 %vm703_vm1, %v2234_v35  ;;  %2182 = vmatmul.msk.bf16.gmra.mxu3 %vm703_vm1, %v2250_v36 }
  0x92   : > { %2135 = vmatmul.msk.bf16.gmra.mxu0 %vm703_vm1, %v2203_v37  ;;  %2151 = vmatmul.msk.bf16.gmra.mxu1 %vm703_vm1, %v2219_v38 }
  0x93   : > { %2167 = vmatmul.msk.bf16.gmra.mxu2 %vm703_vm1, %v2235_v39  ;;  %2183 = vmatmul.msk.bf16.gmra.mxu3 %vm703_vm1, %v2251_v40 }
  0x9f   : > { %v911_v44 = vpop.f32.mrf.mxu0  ;;  %v991_v45 = vpop.f32.mrf.mxu1 }
  0xa0   : > { %v1231_v48 = vadd.f32 %v2454_v41, %v911_v44  ;;  %v1263_v49 = vadd.f32 %v2454_v41, %v991_v45  ;;  %v2206_v45 = vld [vmem:[%s2385_s27 + $0x50] sm:$0xff] }
  0xa2   : > { %v1359_v50 = vmax.f32 %v1231_v48, 0.0  ;;  %v1391_v51 = vmax.f32 %v1263_v49, 0.0  ;;  %2136 = vmatmul.msk.bf16.gmra.mxu0 %vm703_vm1, %v2204_v42  ;;  %2152 = vmatmul.msk.bf16.gmra.mxu1 %vm703_vm1, %v2220_v43 }
  0xa3   : > { %2168 = vmatmul.msk.bf16.gmra.mxu2 %vm703_vm1, %v2236_v46  ;;  %2184 = vmatmul.msk.bf16.gmra.mxu3 %vm703_vm1, %v2252_v47  ;;  %v2222_v46 = vld [vmem:[%s2385_s27 + $0xd0] sm:$0xff] }
  0xa4   : > { %v1487_v52 = vpack.c.bf16 %v1359_v50, %v1359_v50  ;;  %v1519_v53 = vpack.c.bf16 %v1391_v51, %v1391_v51  ;;  %v2238_v51 = vld [vmem:[%s2385_s27 + $0x150] sm:$0xff] }
  0xa6   : > { %1616 = vst.msk [vmem:[%s2469_s5] sm:$0xf] %vm1615_vm2, %v1487_v52  ;;  %v1071_v54 = vpop.f32.mrf.mxu2  ;;  %v1151_v55 = vpop.f32.mrf.mxu3  ;;  %v2254_v52 = vld [vmem:[%s2385_s27 + $0x1d0] sm:$0xff] }
  0xa7   : > { %1648 = vst.msk [vmem:[%s2469_s5 + $0x80] sm:$0xf] %vm1615_vm2, %v1519_v53  ;;  %v1295_v56 = vadd.f32 %v2454_v41, %v1071_v54  ;;  %v1327_v57 = vadd.f32 %v2454_v41, %v1151_v55  ;;  %v913_v58 = vpop.f32.mrf.mxu0  ;;  %v993_v59 = vpop.f32.mrf.mxu1 }
  0xa8   : > { %v1232_v60 = vadd.f32 %v2454_v41, %v913_v58  ;;  %v1264_v61 = vadd.f32 %v2454_v41, %v993_v59 }
  0xa9   : > { %v1423_v62 = vmax.f32 %v1295_v56, 0.0  ;;  %v1455_v63 = vmax.f32 %v1327_v57, 0.0 }
  0xaa   : > { %v1360_v0 = vmax.f32 %v1232_v60, 0.0  ;;  %v1392_v1 = vmax.f32 %v1264_v61, 0.0 }
  0xab   : > { %v1551_v2 = vpack.c.bf16 %v1423_v62, %v1423_v62  ;;  %v1583_v3 = vpack.c.bf16 %v1455_v63, %v1455_v63 }
  0xac   : > { %v1488_v4 = vpack.c.bf16 %v1360_v0, %v1360_v0  ;;  %v1520_v5 = vpack.c.bf16 %v1392_v1, %v1392_v1 }
  0xad   : > { %1680 = vst.msk [vmem:[%s2469_s5 + $0x100] sm:$0xf] %vm1615_vm2, %v1551_v2 }
  0xae   : > { %1712 = vst.msk [vmem:[%s2469_s5 + $0x180] sm:$0xf] %vm1615_vm2, %v1583_v3  ;;  %v1073_v6 = vpop.f32.mrf.mxu2  ;;  %v1153_v7 = vpop.f32.mrf.mxu3 }
  0xaf   : > { %1617 = vst.msk [vmem:[%s2469_s5 + $0x4] sm:$0xf] %vm1615_vm2, %v1488_v4  ;;  %v1296_v10 = vadd.f32 %v2454_v41, %v1073_v6  ;;  %v1328_v11 = vadd.f32 %v2454_v41, %v1153_v7  ;;  %v916_v12 = vpop.f32.mrf.mxu0  ;;  %v996_v13 = vpop.f32.mrf.mxu1 }
  0xb0   : > { %1649 = vst.msk [vmem:[%s2469_s5 + $0x84] sm:$0xf] %vm1615_vm2, %v1520_v5  ;;  %v1233_v16 = vadd.f32 %v2454_v41, %v916_v12  ;;  %v1265_v17 = vadd.f32 %v2454_v41, %v996_v13 }
  0xb1   : > { %v1424_v18 = vmax.f32 %v1296_v10, 0.0  ;;  %v1456_v19 = vmax.f32 %v1328_v11, 0.0 }
  0xb2   : > { %v1361_v20 = vmax.f32 %v1233_v16, 0.0  ;;  %v1393_v21 = vmax.f32 %v1265_v17, 0.0  ;;  %2137 = vmatmul.msk.bf16.gmra.mxu0 %vm703_vm1, %v2205_v8  ;;  %2153 = vmatmul.msk.bf16.gmra.mxu1 %vm703_vm1, %v2221_v9  ;;  %v2207_v17 = vld [vmem:[%s2385_s27 + $0x58] sm:$0xff] }
  0xb3   : > { %v1552_v22 = vpack.c.bf16 %v1424_v18, %v1424_v18  ;;  %v1584_v23 = vpack.c.bf16 %v1456_v19, %v1456_v19  ;;  %2169 = vmatmul.msk.bf16.gmra.mxu2 %vm703_vm1, %v2237_v14  ;;  %2185 = vmatmul.msk.bf16.gmra.mxu3 %vm703_vm1, %v2253_v15  ;;  %v2223_v18 = vld [vmem:[%s2385_s27 + $0xd8] sm:$0xff] }
  0xb4   : > { %v1489_v24 = vpack.c.bf16 %v1361_v20, %v1361_v20  ;;  %v1521_v25 = vpack.c.bf16 %v1393_v21, %v1393_v21 }
  0xb5   : > { %1681 = vst.msk [vmem:[%s2469_s5 + $0x104] sm:$0xf] %vm1615_vm2, %v1552_v22 }
  0xb6   : > { %1713 = vst.msk [vmem:[%s2469_s5 + $0x184] sm:$0xf] %vm1615_vm2, %v1584_v23  ;;  %v1076_v26 = vpop.f32.mrf.mxu2  ;;  %v1156_v27 = vpop.f32.mrf.mxu3  ;;  %v2239_v23 = vld [vmem:[%s2385_s27 + $0x158] sm:$0xff] }
  0xb7   : > { %1618 = vst.msk [vmem:[%s2469_s5 + $0x8] sm:$0xf] %vm1615_vm2, %v1489_v24  ;;  %v1297_v28 = vadd.f32 %v2454_v41, %v1076_v26  ;;  %v1329_v29 = vadd.f32 %v2454_v41, %v1156_v27  ;;  %v918_v30 = vpop.f32.mrf.mxu0  ;;  %v998_v31 = vpop.f32.mrf.mxu1  ;;  %v2255_v24 = vld [vmem:[%s2385_s27 + $0x1d8] sm:$0xff] }
  0xb8   : > { %1650 = vst.msk [vmem:[%s2469_s5 + $0x88] sm:$0xf] %vm1615_vm2, %v1521_v25  ;;  %v1234_v32 = vadd.f32 %v2454_v41, %v918_v30  ;;  %v1266_v33 = vadd.f32 %v2454_v41, %v998_v31 }
  0xb9   : > { %v1425_v34 = vmax.f32 %v1297_v28, 0.0  ;;  %v1457_v35 = vmax.f32 %v1329_v29, 0.0 }
  0xba   : > { %v1362_v36 = vmax.f32 %v1234_v32, 0.0  ;;  %v1394_v37 = vmax.f32 %v1266_v33, 0.0 }
  0xbb   : > { %v1553_v38 = vpack.c.bf16 %v1425_v34, %v1425_v34  ;;  %v1585_v39 = vpack.c.bf16 %v1457_v35, %v1457_v35 }
  0xbc   : > { %v1490_v40 = vpack.c.bf16 %v1362_v36, %v1362_v36  ;;  %v1522_v42 = vpack.c.bf16 %v1394_v37, %v1394_v37 }
  0xbd   : > { %1682 = vst.msk [vmem:[%s2469_s5 + $0x108] sm:$0xf] %vm1615_vm2, %v1553_v38 }
  0xbe   : > { %1714 = vst.msk [vmem:[%s2469_s5 + $0x188] sm:$0xf] %vm1615_vm2, %v1585_v39  ;;  %v1078_v43 = vpop.f32.mrf.mxu2  ;;  %v1158_v44 = vpop.f32.mrf.mxu3 }
  0xbf   : > { %1619 = vst.msk [vmem:[%s2469_s5 + $0xc] sm:$0xf] %vm1615_vm2, %v1490_v40  ;;  %v1298_v47 = vadd.f32 %v2454_v41, %v1078_v43  ;;  %v1330_v48 = vadd.f32 %v2454_v41, %v1158_v44  ;;  %v921_v49 = vpop.f32.mrf.mxu0  ;;  %v1001_v50 = vpop.f32.mrf.mxu1 }
  0xc0   : > { %1651 = vst.msk [vmem:[%s2469_s5 + $0x8c] sm:$0xf] %vm1615_vm2, %v1522_v42  ;;  %v1235_v53 = vadd.f32 %v2454_v41, %v921_v49  ;;  %v1267_v54 = vadd.f32 %v2454_v41, %v1001_v50 }
  0xc1   : > { %v1426_v55 = vmax.f32 %v1298_v47, 0.0  ;;  %v1458_v56 = vmax.f32 %v1330_v48, 0.0 }
  0xc2   : > { %v1363_v57 = vmax.f32 %v1235_v53, 0.0  ;;  %v1395_v58 = vmax.f32 %v1267_v54, 0.0  ;;  %2138 = vmatmul.msk.bf16.gmra.mxu0 %vm703_vm1, %v2206_v45  ;;  %2154 = vmatmul.msk.bf16.gmra.mxu1 %vm703_vm1, %v2222_v46  ;;  %v2208_v54 = vld [vmem:[%s2385_s27 + $0x60] sm:$0xff] }
  0xc3   : > { %v1554_v59 = vpack.c.bf16 %v1426_v55, %v1426_v55  ;;  %v1586_v60 = vpack.c.bf16 %v1458_v56, %v1458_v56  ;;  %2170 = vmatmul.msk.bf16.gmra.mxu2 %vm703_vm1, %v2238_v51  ;;  %2186 = vmatmul.msk.bf16.gmra.mxu3 %vm703_vm1, %v2254_v52  ;;  %v2224_v55 = vld [vmem:[%s2385_s27 + $0xe0] sm:$0xff] }
  0xc4   : > { %v1491_v61 = vpack.c.bf16 %v1363_v57, %v1363_v57  ;;  %v1523_v62 = vpack.c.bf16 %v1395_v58, %v1395_v58 }
  0xc5   : > { %1683 = vst.msk [vmem:[%s2469_s5 + $0x10c] sm:$0xf] %vm1615_vm2, %v1554_v59 }
  0xc6   : > { %1715 = vst.msk [vmem:[%s2469_s5 + $0x18c] sm:$0xf] %vm1615_vm2, %v1586_v60  ;;  %v1081_v63 = vpop.f32.mrf.mxu2  ;;  %v1161_v0 = vpop.f32.mrf.mxu3  ;;  %v2240_v60 = vld [vmem:[%s2385_s27 + $0x160] sm:$0xff] }
  0xc7   : > { %1620 = vst.msk [vmem:[%s2469_s5 + $0x10] sm:$0xf] %vm1615_vm2, %v1491_v61  ;;  %v1299_v1 = vadd.f32 %v2454_v41, %v1081_v63  ;;  %v1331_v2 = vadd.f32 %v2454_v41, %v1161_v0  ;;  %v923_v3 = vpop.f32.mrf.mxu0  ;;  %v1003_v4 = vpop.f32.mrf.mxu1  ;;  %v2256_v61 = vld [vmem:[%s2385_s27 + $0x1e0] sm:$0xff] }
  0xc8   : > { %1652 = vst.msk [vmem:[%s2469_s5 + $0x90] sm:$0xf] %vm1615_vm2, %v1523_v62  ;;  %v1236_v5 = vadd.f32 %v2454_v41, %v923_v3  ;;  %v1268_v6 = vadd.f32 %v2454_v41, %v1003_v4 }
  0xc9   : > { %v1427_v7 = vmax.f32 %v1299_v1, 0.0  ;;  %v1459_v8 = vmax.f32 %v1331_v2, 0.0 }
  0xca   : > { %v1364_v9 = vmax.f32 %v1236_v5, 0.0  ;;  %v1396_v10 = vmax.f32 %v1268_v6, 0.0 }
  0xcb   : > { %v1555_v11 = vpack.c.bf16 %v1427_v7, %v1427_v7  ;;  %v1587_v12 = vpack.c.bf16 %v1459_v8, %v1459_v8 }
  0xcc   : > { %v1492_v13 = vpack.c.bf16 %v1364_v9, %v1364_v9  ;;  %v1524_v14 = vpack.c.bf16 %v1396_v10, %v1396_v10 }
  0xcd   : > { %1684 = vst.msk [vmem:[%s2469_s5 + $0x110] sm:$0xf] %vm1615_vm2, %v1555_v11 }
  0xce   : > { %1716 = vst.msk [vmem:[%s2469_s5 + $0x190] sm:$0xf] %vm1615_vm2, %v1587_v12  ;;  %v1083_v15 = vpop.f32.mrf.mxu2  ;;  %v1163_v16 = vpop.f32.mrf.mxu3 }
  0xcf   : > { %1621 = vst.msk [vmem:[%s2469_s5 + $0x14] sm:$0xf] %vm1615_vm2, %v1492_v13  ;;  %v1300_v19 = vadd.f32 %v2454_v41, %v1083_v15  ;;  %v1332_v20 = vadd.f32 %v2454_v41, %v1163_v16  ;;  %v926_v21 = vpop.f32.mrf.mxu0  ;;  %v1006_v22 = vpop.f32.mrf.mxu1 }
  0xd0   : > { %1653 = vst.msk [vmem:[%s2469_s5 + $0x94] sm:$0xf] %vm1615_vm2, %v1524_v14  ;;  %v1237_v25 = vadd.f32 %v2454_v41, %v926_v21  ;;  %v1269_v26 = vadd.f32 %v2454_v41, %v1006_v22 }
  0xd1   : > { %v1428_v27 = vmax.f32 %v1300_v19, 0.0  ;;  %v1460_v28 = vmax.f32 %v1332_v20, 0.0 }
  0xd2   : > { %v1365_v29 = vmax.f32 %v1237_v25, 0.0  ;;  %v1397_v30 = vmax.f32 %v1269_v26, 0.0  ;;  %2139 = vmatmul.msk.bf16.gmra.mxu0 %vm703_vm1, %v2207_v17  ;;  %2155 = vmatmul.msk.bf16.gmra.mxu1 %vm703_vm1, %v2223_v18  ;;  %v2209_v26 = vld [vmem:[%s2385_s27 + $0x68] sm:$0xff] }
  0xd3   : > { %v1556_v31 = vpack.c.bf16 %v1428_v27, %v1428_v27  ;;  %v1588_v32 = vpack.c.bf16 %v1460_v28, %v1460_v28  ;;  %2171 = vmatmul.msk.bf16.gmra.mxu2 %vm703_vm1, %v2239_v23  ;;  %2187 = vmatmul.msk.bf16.gmra.mxu3 %vm703_vm1, %v2255_v24  ;;  %v2225_v27 = vld [vmem:[%s2385_s27 + $0xe8] sm:$0xff] }
  0xd4   : > { %v1493_v33 = vpack.c.bf16 %v1365_v29, %v1365_v29  ;;  %v1525_v34 = vpack.c.bf16 %v1397_v30, %v1397_v30 }
  0xd5   : > { %1685 = vst.msk [vmem:[%s2469_s5 + $0x114] sm:$0xf] %vm1615_vm2, %v1556_v31 }
  0xd6   : > { %1717 = vst.msk [vmem:[%s2469_s5 + $0x194] sm:$0xf] %vm1615_vm2, %v1588_v32  ;;  %v1086_v35 = vpop.f32.mrf.mxu2  ;;  %v1166_v36 = vpop.f32.mrf.mxu3  ;;  %v2241_v32 = vld [vmem:[%s2385_s27 + $0x168] sm:$0xff] }
  0xd7   : > { %1622 = vst.msk [vmem:[%s2469_s5 + $0x18] sm:$0xf] %vm1615_vm2, %v1493_v33  ;;  %v1301_v37 = vadd.f32 %v2454_v41, %v1086_v35  ;;  %v1333_v38 = vadd.f32 %v2454_v41, %v1166_v36  ;;  %v928_v39 = vpop.f32.mrf.mxu0  ;;  %v1008_v40 = vpop.f32.mrf.mxu1  ;;  %v2257_v33 = vld [vmem:[%s2385_s27 + $0x1e8] sm:$0xff] }
  0xd8   : > { %1654 = vst.msk [vmem:[%s2469_s5 + $0x98] sm:$0xf] %vm1615_vm2, %v1525_v34  ;;  %v1238_v42 = vadd.f32 %v2454_v41, %v928_v39  ;;  %v1270_v43 = vadd.f32 %v2454_v41, %v1008_v40 }
  0xd9   : > { %v1429_v44 = vmax.f32 %v1301_v37, 0.0  ;;  %v1461_v45 = vmax.f32 %v1333_v38, 0.0 }
  0xda   : > { %v1366_v46 = vmax.f32 %v1238_v42, 0.0  ;;  %v1398_v47 = vmax.f32 %v1270_v43, 0.0 }
  0xdb   : > { %v1557_v48 = vpack.c.bf16 %v1429_v44, %v1429_v44  ;;  %v1589_v49 = vpack.c.bf16 %v1461_v45, %v1461_v45 }
  0xdc   : > { %v1494_v50 = vpack.c.bf16 %v1366_v46, %v1366_v46  ;;  %v1526_v51 = vpack.c.bf16 %v1398_v47, %v1398_v47 }
  0xdd   : > { %1686 = vst.msk [vmem:[%s2469_s5 + $0x118] sm:$0xf] %vm1615_vm2, %v1557_v48 }
  0xde   : > { %1718 = vst.msk [vmem:[%s2469_s5 + $0x198] sm:$0xf] %vm1615_vm2, %v1589_v49  ;;  %v1088_v52 = vpop.f32.mrf.mxu2  ;;  %v1168_v53 = vpop.f32.mrf.mxu3 }
  0xdf   : > { %1623 = vst.msk [vmem:[%s2469_s5 + $0x1c] sm:$0xf] %vm1615_vm2, %v1494_v50  ;;  %v1302_v56 = vadd.f32 %v2454_v41, %v1088_v52  ;;  %v1334_v57 = vadd.f32 %v2454_v41, %v1168_v53  ;;  %v931_v58 = vpop.f32.mrf.mxu0  ;;  %v1011_v59 = vpop.f32.mrf.mxu1 }
  0xe0   : > { %1655 = vst.msk [vmem:[%s2469_s5 + $0x9c] sm:$0xf] %vm1615_vm2, %v1526_v51  ;;  %v1239_v62 = vadd.f32 %v2454_v41, %v931_v58  ;;  %v1271_v63 = vadd.f32 %v2454_v41, %v1011_v59 }
  0xe1   : > { %v1430_v0 = vmax.f32 %v1302_v56, 0.0  ;;  %v1462_v1 = vmax.f32 %v1334_v57, 0.0 }
  0xe2   : > { %v1367_v2 = vmax.f32 %v1239_v62, 0.0  ;;  %v1399_v3 = vmax.f32 %v1271_v63, 0.0  ;;  %2140 = vmatmul.msk.bf16.gmra.mxu0 %vm703_vm1, %v2208_v54  ;;  %2156 = vmatmul.msk.bf16.gmra.mxu1 %vm703_vm1, %v2224_v55  ;;  %v2210_v63 = vld [vmem:[%s2385_s27 + $0x70] sm:$0xff] }
  0xe3   : > { %v1558_v4 = vpack.c.bf16 %v1430_v0, %v1430_v0  ;;  %v1590_v5 = vpack.c.bf16 %v1462_v1, %v1462_v1  ;;  %2172 = vmatmul.msk.bf16.gmra.mxu2 %vm703_vm1, %v2240_v60  ;;  %2188 = vmatmul.msk.bf16.gmra.mxu3 %vm703_vm1, %v2256_v61  ;;  %v2226_v0 = vld [vmem:[%s2385_s27 + $0xf0] sm:$0xff] }
  0xe4   : > { %v1495_v6 = vpack.c.bf16 %v1367_v2, %v1367_v2  ;;  %v1527_v7 = vpack.c.bf16 %v1399_v3, %v1399_v3 }
  0xe5   : > { %1687 = vst.msk [vmem:[%s2469_s5 + $0x11c] sm:$0xf] %vm1615_vm2, %v1558_v4 }
  0xe6   : > { %1719 = vst.msk [vmem:[%s2469_s5 + $0x19c] sm:$0xf] %vm1615_vm2, %v1590_v5  ;;  %v1091_v8 = vpop.f32.mrf.mxu2  ;;  %v1171_v9 = vpop.f32.mrf.mxu3  ;;  %v2242_v5 = vld [vmem:[%s2385_s27 + $0x170] sm:$0xff] }
  0xe7   : > { %1624 = vst.msk [vmem:[%s2469_s5 + $0x20] sm:$0xf] %vm1615_vm2, %v1495_v6  ;;  %v1303_v10 = vadd.f32 %v2454_v41, %v1091_v8  ;;  %v1335_v11 = vadd.f32 %v2454_v41, %v1171_v9  ;;  %v933_v12 = vpop.f32.mrf.mxu0  ;;  %v1013_v13 = vpop.f32.mrf.mxu1  ;;  %v2258_v6 = vld [vmem:[%s2385_s27 + $0x1f0] sm:$0xff] }
  0xe8   : > { %1656 = vst.msk [vmem:[%s2469_s5 + $0xa0] sm:$0xf] %vm1615_vm2, %v1527_v7  ;;  %v1240_v14 = vadd.f32 %v2454_v41, %v933_v12  ;;  %v1272_v15 = vadd.f32 %v2454_v41, %v1013_v13 }
  0xe9   : > { %v1431_v16 = vmax.f32 %v1303_v10, 0.0  ;;  %v1463_v17 = vmax.f32 %v1335_v11, 0.0 }
  0xea   : > { %v1368_v18 = vmax.f32 %v1240_v14, 0.0  ;;  %v1400_v19 = vmax.f32 %v1272_v15, 0.0 }
  0xeb   : > { %v1559_v20 = vpack.c.bf16 %v1431_v16, %v1431_v16  ;;  %v1591_v21 = vpack.c.bf16 %v1463_v17, %v1463_v17 }
  0xec   : > { %v1496_v22 = vpack.c.bf16 %v1368_v18, %v1368_v18  ;;  %v1528_v23 = vpack.c.bf16 %v1400_v19, %v1400_v19 }
  0xed   : > { %1688 = vst.msk [vmem:[%s2469_s5 + $0x120] sm:$0xf] %vm1615_vm2, %v1559_v20 }
  0xee   : > { %1720 = vst.msk [vmem:[%s2469_s5 + $0x1a0] sm:$0xf] %vm1615_vm2, %v1591_v21  ;;  %v1093_v24 = vpop.f32.mrf.mxu2  ;;  %v1173_v25 = vpop.f32.mrf.mxu3 }
  0xef   : > { %1625 = vst.msk [vmem:[%s2469_s5 + $0x24] sm:$0xf] %vm1615_vm2, %v1496_v22  ;;  %v1304_v28 = vadd.f32 %v2454_v41, %v1093_v24  ;;  %v1336_v29 = vadd.f32 %v2454_v41, %v1173_v25  ;;  %v936_v30 = vpop.f32.mrf.mxu0  ;;  %v1016_v31 = vpop.f32.mrf.mxu1 }
  0xf0   : > { %1657 = vst.msk [vmem:[%s2469_s5 + $0xa4] sm:$0xf] %vm1615_vm2, %v1528_v23  ;;  %v1241_v34 = vadd.f32 %v2454_v41, %v936_v30  ;;  %v1273_v35 = vadd.f32 %v2454_v41, %v1016_v31 }
  0xf1   : > { %v1432_v36 = vmax.f32 %v1304_v28, 0.0  ;;  %v1464_v37 = vmax.f32 %v1336_v29, 0.0 }
  0xf2   : > { %v1369_v38 = vmax.f32 %v1241_v34, 0.0  ;;  %v1401_v39 = vmax.f32 %v1273_v35, 0.0  ;;  %2141 = vmatmul.msk.bf16.gmra.mxu0 %vm703_vm1, %v2209_v26  ;;  %2157 = vmatmul.msk.bf16.gmra.mxu1 %vm703_vm1, %v2225_v27  ;;  %v2211_v35 = vld [vmem:[%s2385_s27 + $0x78] sm:$0xff] }
  0xf3   : > { %v1560_v40 = vpack.c.bf16 %v1432_v36, %v1432_v36  ;;  %v1592_v42 = vpack.c.bf16 %v1464_v37, %v1464_v37  ;;  %2173 = vmatmul.msk.bf16.gmra.mxu2 %vm703_vm1, %v2241_v32  ;;  %2189 = vmatmul.msk.bf16.gmra.mxu3 %vm703_vm1, %v2257_v33  ;;  %v2227_v36 = vld [vmem:[%s2385_s27 + $0xf8] sm:$0xff] }
  0xf4   : > { %v1497_v43 = vpack.c.bf16 %v1369_v38, %v1369_v38  ;;  %v1529_v44 = vpack.c.bf16 %v1401_v39, %v1401_v39 }
  0xf5   : > { %1689 = vst.msk [vmem:[%s2469_s5 + $0x124] sm:$0xf] %vm1615_vm2, %v1560_v40 }
  0xf6   : > { %1721 = vst.msk [vmem:[%s2469_s5 + $0x1a4] sm:$0xf] %vm1615_vm2, %v1592_v42  ;;  %v1096_v45 = vpop.f32.mrf.mxu2  ;;  %v1176_v46 = vpop.f32.mrf.mxu3  ;;  %v2243_v42 = vld [vmem:[%s2385_s27 + $0x178] sm:$0xff] }
  0xf7   : > { %1626 = vst.msk [vmem:[%s2469_s5 + $0x28] sm:$0xf] %vm1615_vm2, %v1497_v43  ;;  %v1305_v47 = vadd.f32 %v2454_v41, %v1096_v45  ;;  %v1337_v48 = vadd.f32 %v2454_v41, %v1176_v46  ;;  %v938_v49 = vpop.f32.mrf.mxu0  ;;  %v1018_v50 = vpop.f32.mrf.mxu1  ;;  %v2259_v43 = vld [vmem:[%s2385_s27 + $0x1f8] sm:$0xff] }
  0xf8   : > { %1658 = vst.msk [vmem:[%s2469_s5 + $0xa8] sm:$0xf] %vm1615_vm2, %v1529_v44  ;;  %v1242_v51 = vadd.f32 %v2454_v41, %v938_v49  ;;  %v1274_v52 = vadd.f32 %v2454_v41, %v1018_v50 }
  0xf9   : > { %v1433_v53 = vmax.f32 %v1305_v47, 0.0  ;;  %v1465_v54 = vmax.f32 %v1337_v48, 0.0 }
  0xfa   : > { %v1370_v55 = vmax.f32 %v1242_v51, 0.0  ;;  %v1402_v56 = vmax.f32 %v1274_v52, 0.0 }
  0xfb   : > { %v1561_v57 = vpack.c.bf16 %v1433_v53, %v1433_v53  ;;  %v1593_v58 = vpack.c.bf16 %v1465_v54, %v1465_v54 }
  0xfc   : > { %v1498_v59 = vpack.c.bf16 %v1370_v55, %v1370_v55  ;;  %v1530_v60 = vpack.c.bf16 %v1402_v56, %v1402_v56 }
  0xfd   : > { %1690 = vst.msk [vmem:[%s2469_s5 + $0x128] sm:$0xf] %vm1615_vm2, %v1561_v57 }
  0xfe   : > { %1722 = vst.msk [vmem:[%s2469_s5 + $0x1a8] sm:$0xf] %vm1615_vm2, %v1593_v58  ;;  %v1098_v61 = vpop.f32.mrf.mxu2  ;;  %v1178_v62 = vpop.f32.mrf.mxu3 }
  0xff   : > { %1627 = vst.msk [vmem:[%s2469_s5 + $0x2c] sm:$0xf] %vm1615_vm2, %v1498_v59  ;;  %v1306_v1 = vadd.f32 %v2454_v41, %v1098_v61  ;;  %v1338_v2 = vadd.f32 %v2454_v41, %v1178_v62  ;;  %v941_v3 = vpop.f32.mrf.mxu0  ;;  %v1021_v4 = vpop.f32.mrf.mxu1 }
 0x100   : > { %1659 = vst.msk [vmem:[%s2469_s5 + $0xac] sm:$0xf] %vm1615_vm2, %v1530_v60  ;;  %v1243_v7 = vadd.f32 %v2454_v41, %v941_v3  ;;  %v1275_v8 = vadd.f32 %v2454_v41, %v1021_v4 }
 0x101   : > { %v1434_v9 = vmax.f32 %v1306_v1, 0.0  ;;  %v1466_v10 = vmax.f32 %v1338_v2, 0.0 }
 0x102   : > { %v1371_v11 = vmax.f32 %v1243_v7, 0.0  ;;  %v1403_v12 = vmax.f32 %v1275_v8, 0.0  ;;  %2142 = vmatmul.msk.bf16.gmra.mxu0 %vm703_vm1, %v2210_v63  ;;  %2158 = vmatmul.msk.bf16.gmra.mxu1 %vm703_vm1, %v2226_v0 }
 0x103   : > { %v1562_v13 = vpack.c.bf16 %v1434_v9, %v1434_v9  ;;  %v1594_v14 = vpack.c.bf16 %v1466_v10, %v1466_v10  ;;  %2174 = vmatmul.msk.bf16.gmra.mxu2 %vm703_vm1, %v2242_v5  ;;  %2190 = vmatmul.msk.bf16.gmra.mxu3 %vm703_vm1, %v2258_v6 }
 0x104   : > { %v1499_v15 = vpack.c.bf16 %v1371_v11, %v1371_v11  ;;  %v1531_v16 = vpack.c.bf16 %v1403_v12, %v1403_v12 }
 0x105   : > { %1691 = vst.msk [vmem:[%s2469_s5 + $0x12c] sm:$0xf] %vm1615_vm2, %v1562_v13 }
 0x106   : > { %1723 = vst.msk [vmem:[%s2469_s5 + $0x1ac] sm:$0xf] %vm1615_vm2, %v1594_v14  ;;  %v1101_v17 = vpop.f32.mrf.mxu2  ;;  %v1181_v18 = vpop.f32.mrf.mxu3 }
 0x107   : > { %1628 = vst.msk [vmem:[%s2469_s5 + $0x30] sm:$0xf] %vm1615_vm2, %v1499_v15  ;;  %v1307_v19 = vadd.f32 %v2454_v41, %v1101_v17  ;;  %v1339_v20 = vadd.f32 %v2454_v41, %v1181_v18  ;;  %v943_v21 = vpop.f32.mrf.mxu0  ;;  %v1023_v22 = vpop.f32.mrf.mxu1 }
 0x108   : > { %1660 = vst.msk [vmem:[%s2469_s5 + $0xb0] sm:$0xf] %vm1615_vm2, %v1531_v16  ;;  %v1244_v23 = vadd.f32 %v2454_v41, %v943_v21  ;;  %v1276_v24 = vadd.f32 %v2454_v41, %v1023_v22 }
 0x109   : > { %v1435_v25 = vmax.f32 %v1307_v19, 0.0  ;;  %v1467_v26 = vmax.f32 %v1339_v20, 0.0 }
 0x10a   : > { %v1372_v27 = vmax.f32 %v1244_v23, 0.0  ;;  %v1404_v28 = vmax.f32 %v1276_v24, 0.0 }
 0x10b   : > { %v1563_v29 = vpack.c.bf16 %v1435_v25, %v1435_v25  ;;  %v1595_v30 = vpack.c.bf16 %v1467_v26, %v1467_v26 }
 0x10c   : > { %v1500_v31 = vpack.c.bf16 %v1372_v27, %v1372_v27  ;;  %v1532_v32 = vpack.c.bf16 %v1404_v28, %v1404_v28 }
 0x10d   : > { %1692 = vst.msk [vmem:[%s2469_s5 + $0x130] sm:$0xf] %vm1615_vm2, %v1563_v29 }
 0x10e   : > { %1724 = vst.msk [vmem:[%s2469_s5 + $0x1b0] sm:$0xf] %vm1615_vm2, %v1595_v30  ;;  %v1103_v33 = vpop.f32.mrf.mxu2  ;;  %v1183_v34 = vpop.f32.mrf.mxu3 }
 0x10f   : > { %1629 = vst.msk [vmem:[%s2469_s5 + $0x34] sm:$0xf] %vm1615_vm2, %v1500_v31  ;;  %v1308_v37 = vadd.f32 %v2454_v41, %v1103_v33  ;;  %v1340_v38 = vadd.f32 %v2454_v41, %v1183_v34  ;;  %v946_v39 = vpop.f32.mrf.mxu0  ;;  %v1026_v40 = vpop.f32.mrf.mxu1 }
 0x110   : > { %1661 = vst.msk [vmem:[%s2469_s5 + $0xb4] sm:$0xf] %vm1615_vm2, %v1532_v32  ;;  %v1245_v44 = vadd.f32 %v2454_v41, %v946_v39  ;;  %v1277_v45 = vadd.f32 %v2454_v41, %v1026_v40 }
 0x111   : > { %v1436_v46 = vmax.f32 %v1308_v37, 0.0  ;;  %v1468_v47 = vmax.f32 %v1340_v38, 0.0 }
 0x112   : > { %v1373_v48 = vmax.f32 %v1245_v44, 0.0  ;;  %v1405_v49 = vmax.f32 %v1277_v45, 0.0  ;;  %2143 = vmatmul.msk.bf16.gmra.mxu0 %vm703_vm1, %v2211_v35  ;;  %2159 = vmatmul.msk.bf16.gmra.mxu1 %vm703_vm1, %v2227_v36 }
 0x113   : > { %v1564_v50 = vpack.c.bf16 %v1436_v46, %v1436_v46  ;;  %v1596_v51 = vpack.c.bf16 %v1468_v47, %v1468_v47  ;;  %2175 = vmatmul.msk.bf16.gmra.mxu2 %vm703_vm1, %v2243_v42  ;;  %2191 = vmatmul.msk.bf16.gmra.mxu3 %vm703_vm1, %v2259_v43 }
 0x114   : > { %v1501_v52 = vpack.c.bf16 %v1373_v48, %v1373_v48  ;;  %v1533_v53 = vpack.c.bf16 %v1405_v49, %v1405_v49 }
 0x115   : > { %1693 = vst.msk [vmem:[%s2469_s5 + $0x134] sm:$0xf] %vm1615_vm2, %v1564_v50 }
 0x116   : > { %1725 = vst.msk [vmem:[%s2469_s5 + $0x1b4] sm:$0xf] %vm1615_vm2, %v1596_v51  ;;  %v1106_v54 = vpop.f32.mrf.mxu2  ;;  %v1186_v55 = vpop.f32.mrf.mxu3 }
 0x117   : > { %1630 = vst.msk [vmem:[%s2469_s5 + $0x38] sm:$0xf] %vm1615_vm2, %v1501_v52  ;;  %v1309_v56 = vadd.f32 %v2454_v41, %v1106_v54  ;;  %v1341_v57 = vadd.f32 %v2454_v41, %v1186_v55  ;;  %v948_v58 = vpop.f32.mrf.mxu0  ;;  %v1028_v59 = vpop.f32.mrf.mxu1 }
 0x118   : > { %1662 = vst.msk [vmem:[%s2469_s5 + $0xb8] sm:$0xf] %vm1615_vm2, %v1533_v53  ;;  %v1246_v60 = vadd.f32 %v2454_v41, %v948_v58  ;;  %v1278_v61 = vadd.f32 %v2454_v41, %v1028_v59 }
 0x119   : > { %v1437_v62 = vmax.f32 %v1309_v56, 0.0  ;;  %v1469_v63 = vmax.f32 %v1341_v57, 0.0 }
 0x11a   : > { %v1374_v0 = vmax.f32 %v1246_v60, 0.0  ;;  %v1406_v1 = vmax.f32 %v1278_v61, 0.0 }
 0x11b   : > { %v1565_v2 = vpack.c.bf16 %v1437_v62, %v1437_v62  ;;  %v1597_v3 = vpack.c.bf16 %v1469_v63, %v1469_v63 }
 0x11c   : > { %v1502_v4 = vpack.c.bf16 %v1374_v0, %v1374_v0  ;;  %v1534_v5 = vpack.c.bf16 %v1406_v1, %v1406_v1 }
 0x11d   : > { %1694 = vst.msk [vmem:[%s2469_s5 + $0x138] sm:$0xf] %vm1615_vm2, %v1565_v2 }
 0x11e   : > { %1726 = vst.msk [vmem:[%s2469_s5 + $0x1b8] sm:$0xf] %vm1615_vm2, %v1597_v3  ;;  %v1108_v6 = vpop.f32.mrf.mxu2  ;;  %v1188_v7 = vpop.f32.mrf.mxu3 }
 0x11f   : > { %1631 = vst.msk [vmem:[%s2469_s5 + $0x3c] sm:$0xf] %vm1615_vm2, %v1502_v4  ;;  %v1310_v8 = vadd.f32 %v2454_v41, %v1108_v6  ;;  %v1342_v9 = vadd.f32 %v2454_v41, %v1188_v7  ;;  %v951_v10 = vpop.f32.mrf.mxu0  ;;  %v1031_v11 = vpop.f32.mrf.mxu1 }
 0x120   : > { %1663 = vst.msk [vmem:[%s2469_s5 + $0xbc] sm:$0xf] %vm1615_vm2, %v1534_v5  ;;  %v1247_v12 = vadd.f32 %v2454_v41, %v951_v10  ;;  %v1279_v13 = vadd.f32 %v2454_v41, %v1031_v11 }
 0x121   : > { %v1438_v14 = vmax.f32 %v1310_v8, 0.0  ;;  %v1470_v15 = vmax.f32 %v1342_v9, 0.0 }
 0x122   : > { %v1375_v16 = vmax.f32 %v1247_v12, 0.0  ;;  %v1407_v17 = vmax.f32 %v1279_v13, 0.0 }
 0x123   : > { %v1566_v18 = vpack.c.bf16 %v1438_v14, %v1438_v14  ;;  %v1598_v19 = vpack.c.bf16 %v1470_v15, %v1470_v15 }
 0x124   : > { %v1503_v20 = vpack.c.bf16 %v1375_v16, %v1375_v16  ;;  %v1535_v21 = vpack.c.bf16 %v1407_v17, %v1407_v17 }
 0x125   : > { %1695 = vst.msk [vmem:[%s2469_s5 + $0x13c] sm:$0xf] %vm1615_vm2, %v1566_v18 }
 0x126   : > { %1727 = vst.msk [vmem:[%s2469_s5 + $0x1bc] sm:$0xf] %vm1615_vm2, %v1598_v19  ;;  %v1111_v22 = vpop.f32.mrf.mxu2  ;;  %v1191_v23 = vpop.f32.mrf.mxu3 }
 0x127   : > { %1632 = vst.msk [vmem:[%s2469_s5 + $0x40] sm:$0xf] %vm1615_vm2, %v1503_v20  ;;  %v1311_v24 = vadd.f32 %v2454_v41, %v1111_v22  ;;  %v1343_v25 = vadd.f32 %v2454_v41, %v1191_v23  ;;  %v953_v26 = vpop.f32.mrf.mxu0  ;;  %v1033_v27 = vpop.f32.mrf.mxu1 }
 0x128   : > { %1664 = vst.msk [vmem:[%s2469_s5 + $0xc0] sm:$0xf] %vm1615_vm2, %v1535_v21  ;;  %v1248_v28 = vadd.f32 %v2454_v41, %v953_v26  ;;  %v1280_v29 = vadd.f32 %v2454_v41, %v1033_v27 }
 0x129   : > { %v1439_v30 = vmax.f32 %v1311_v24, 0.0  ;;  %v1471_v31 = vmax.f32 %v1343_v25, 0.0 }
 0x12a   : > { %v1376_v32 = vmax.f32 %v1248_v28, 0.0  ;;  %v1408_v33 = vmax.f32 %v1280_v29, 0.0 }
 0x12b   : > { %v1567_v34 = vpack.c.bf16 %v1439_v30, %v1439_v30  ;;  %v1599_v35 = vpack.c.bf16 %v1471_v31, %v1471_v31 }
 0x12c   : > { %v1504_v36 = vpack.c.bf16 %v1376_v32, %v1376_v32  ;;  %v1536_v37 = vpack.c.bf16 %v1408_v33, %v1408_v33 }
 0x12d   : > { %1696 = vst.msk [vmem:[%s2469_s5 + $0x140] sm:$0xf] %vm1615_vm2, %v1567_v34 }
 0x12e   : > { %1728 = vst.msk [vmem:[%s2469_s5 + $0x1c0] sm:$0xf] %vm1615_vm2, %v1599_v35  ;;  %v1113_v38 = vpop.f32.mrf.mxu2  ;;  %v1193_v39 = vpop.f32.mrf.mxu3 }
 0x12f   : > { %1633 = vst.msk [vmem:[%s2469_s5 + $0x44] sm:$0xf] %vm1615_vm2, %v1504_v36  ;;  %v1312_v40 = vadd.f32 %v2454_v41, %v1113_v38  ;;  %v1344_v42 = vadd.f32 %v2454_v41, %v1193_v39  ;;  %v956_v43 = vpop.f32.mrf.mxu0  ;;  %v1036_v44 = vpop.f32.mrf.mxu1 }
 0x130   : > { %1665 = vst.msk [vmem:[%s2469_s5 + $0xc4] sm:$0xf] %vm1615_vm2, %v1536_v37  ;;  %v1249_v45 = vadd.f32 %v2454_v41, %v956_v43  ;;  %v1281_v46 = vadd.f32 %v2454_v41, %v1036_v44 }
 0x131   : > { %v1440_v47 = vmax.f32 %v1312_v40, 0.0  ;;  %v1472_v48 = vmax.f32 %v1344_v42, 0.0 }
 0x132   : > { %v1377_v49 = vmax.f32 %v1249_v45, 0.0  ;;  %v1409_v50 = vmax.f32 %v1281_v46, 0.0 }
 0x133   : > { %v1568_v51 = vpack.c.bf16 %v1440_v47, %v1440_v47  ;;  %v1600_v52 = vpack.c.bf16 %v1472_v48, %v1472_v48 }
 0x134   : > { %v1505_v53 = vpack.c.bf16 %v1377_v49, %v1377_v49  ;;  %v1537_v54 = vpack.c.bf16 %v1409_v50, %v1409_v50 }
 0x135   : > { %1697 = vst.msk [vmem:[%s2469_s5 + $0x144] sm:$0xf] %vm1615_vm2, %v1568_v51 }
 0x136   : > { %1729 = vst.msk [vmem:[%s2469_s5 + $0x1c4] sm:$0xf] %vm1615_vm2, %v1600_v52  ;;  %v1116_v55 = vpop.f32.mrf.mxu2  ;;  %v1196_v56 = vpop.f32.mrf.mxu3 }
 0x137   : > { %1634 = vst.msk [vmem:[%s2469_s5 + $0x48] sm:$0xf] %vm1615_vm2, %v1505_v53  ;;  %v1313_v57 = vadd.f32 %v2454_v41, %v1116_v55  ;;  %v1345_v58 = vadd.f32 %v2454_v41, %v1196_v56  ;;  %v958_v59 = vpop.f32.mrf.mxu0  ;;  %v1038_v60 = vpop.f32.mrf.mxu1 }
 0x138   : > { %1666 = vst.msk [vmem:[%s2469_s5 + $0xc8] sm:$0xf] %vm1615_vm2, %v1537_v54  ;;  %v1250_v61 = vadd.f32 %v2454_v41, %v958_v59  ;;  %v1282_v62 = vadd.f32 %v2454_v41, %v1038_v60 }
 0x139   : > { %v1441_v63 = vmax.f32 %v1313_v57, 0.0  ;;  %v1473_v0 = vmax.f32 %v1345_v58, 0.0 }
 0x13a   : > { %v1378_v1 = vmax.f32 %v1250_v61, 0.0  ;;  %v1410_v2 = vmax.f32 %v1282_v62, 0.0 }
 0x13b   : > { %v1569_v3 = vpack.c.bf16 %v1441_v63, %v1441_v63  ;;  %v1601_v4 = vpack.c.bf16 %v1473_v0, %v1473_v0 }
 0x13c   : > { %v1506_v5 = vpack.c.bf16 %v1378_v1, %v1378_v1  ;;  %v1538_v6 = vpack.c.bf16 %v1410_v2, %v1410_v2 }
 0x13d   : > { %1698 = vst.msk [vmem:[%s2469_s5 + $0x148] sm:$0xf] %vm1615_vm2, %v1569_v3 }
 0x13e   : > { %1730 = vst.msk [vmem:[%s2469_s5 + $0x1c8] sm:$0xf] %vm1615_vm2, %v1601_v4  ;;  %v1118_v7 = vpop.f32.mrf.mxu2  ;;  %v1198_v8 = vpop.f32.mrf.mxu3 }
 0x13f   : > { %1635 = vst.msk [vmem:[%s2469_s5 + $0x4c] sm:$0xf] %vm1615_vm2, %v1506_v5  ;;  %v1314_v9 = vadd.f32 %v2454_v41, %v1118_v7  ;;  %v1346_v10 = vadd.f32 %v2454_v41, %v1198_v8  ;;  %v961_v11 = vpop.f32.mrf.mxu0  ;;  %v1041_v12 = vpop.f32.mrf.mxu1 }
 0x140   : > { %1667 = vst.msk [vmem:[%s2469_s5 + $0xcc] sm:$0xf] %vm1615_vm2, %v1538_v6  ;;  %v1251_v13 = vadd.f32 %v2454_v41, %v961_v11  ;;  %v1283_v14 = vadd.f32 %v2454_v41, %v1041_v12 }
 0x141   : > { %v1442_v15 = vmax.f32 %v1314_v9, 0.0  ;;  %v1474_v16 = vmax.f32 %v1346_v10, 0.0 }
 0x142   : > { %v1379_v17 = vmax.f32 %v1251_v13, 0.0  ;;  %v1411_v18 = vmax.f32 %v1283_v14, 0.0 }
 0x143   : > { %v1570_v19 = vpack.c.bf16 %v1442_v15, %v1442_v15  ;;  %v1602_v20 = vpack.c.bf16 %v1474_v16, %v1474_v16 }
 0x144   : > { %v1507_v21 = vpack.c.bf16 %v1379_v17, %v1379_v17  ;;  %v1539_v22 = vpack.c.bf16 %v1411_v18, %v1411_v18 }
 0x145   : > { %1699 = vst.msk [vmem:[%s2469_s5 + $0x14c] sm:$0xf] %vm1615_vm2, %v1570_v19 }
 0x146   : > { %1731 = vst.msk [vmem:[%s2469_s5 + $0x1cc] sm:$0xf] %vm1615_vm2, %v1602_v20  ;;  %v1121_v23 = vpop.f32.mrf.mxu2  ;;  %v1201_v24 = vpop.f32.mrf.mxu3 }
 0x147   : > { %1636 = vst.msk [vmem:[%s2469_s5 + $0x50] sm:$0xf] %vm1615_vm2, %v1507_v21  ;;  %v1315_v25 = vadd.f32 %v2454_v41, %v1121_v23  ;;  %v1347_v26 = vadd.f32 %v2454_v41, %v1201_v24  ;;  %v963_v27 = vpop.f32.mrf.mxu0  ;;  %v1043_v28 = vpop.f32.mrf.mxu1 }
 0x148   : > { %1668 = vst.msk [vmem:[%s2469_s5 + $0xd0] sm:$0xf] %vm1615_vm2, %v1539_v22  ;;  %v1252_v29 = vadd.f32 %v2454_v41, %v963_v27  ;;  %v1284_v30 = vadd.f32 %v2454_v41, %v1043_v28 }
 0x149   : > { %v1443_v31 = vmax.f32 %v1315_v25, 0.0  ;;  %v1475_v32 = vmax.f32 %v1347_v26, 0.0 }
 0x14a   : > { %v1380_v33 = vmax.f32 %v1252_v29, 0.0  ;;  %v1412_v34 = vmax.f32 %v1284_v30, 0.0 }
 0x14b   : > { %v1571_v35 = vpack.c.bf16 %v1443_v31, %v1443_v31  ;;  %v1603_v36 = vpack.c.bf16 %v1475_v32, %v1475_v32 }
 0x14c   : > { %v1508_v37 = vpack.c.bf16 %v1380_v33, %v1380_v33  ;;  %v1540_v38 = vpack.c.bf16 %v1412_v34, %v1412_v34 }
 0x14d   : > { %1700 = vst.msk [vmem:[%s2469_s5 + $0x150] sm:$0xf] %vm1615_vm2, %v1571_v35 }
 0x14e   : > { %1732 = vst.msk [vmem:[%s2469_s5 + $0x1d0] sm:$0xf] %vm1615_vm2, %v1603_v36  ;;  %v1123_v39 = vpop.f32.mrf.mxu2  ;;  %v1203_v40 = vpop.f32.mrf.mxu3 }
 0x14f   : > { %1637 = vst.msk [vmem:[%s2469_s5 + $0x54] sm:$0xf] %vm1615_vm2, %v1508_v37  ;;  %v1316_v42 = vadd.f32 %v2454_v41, %v1123_v39  ;;  %v1348_v43 = vadd.f32 %v2454_v41, %v1203_v40  ;;  %v966_v44 = vpop.f32.mrf.mxu0  ;;  %v1046_v45 = vpop.f32.mrf.mxu1 }
 0x150   : > { %1669 = vst.msk [vmem:[%s2469_s5 + $0xd4] sm:$0xf] %vm1615_vm2, %v1540_v38  ;;  %v1253_v46 = vadd.f32 %v2454_v41, %v966_v44  ;;  %v1285_v47 = vadd.f32 %v2454_v41, %v1046_v45  ;;  %v2798_v41 = vld [vmem:[%s2927_s2] ss:$0 sm:$0xff] }
 0x151   : > { %v1444_v48 = vmax.f32 %v1316_v42, 0.0  ;;  %v1476_v49 = vmax.f32 %v1348_v43, 0.0 }
 0x152   : > { %v1381_v50 = vmax.f32 %v1253_v46, 0.0  ;;  %v1413_v51 = vmax.f32 %v1285_v47, 0.0 }
 0x153   : > { %v1572_v52 = vpack.c.bf16 %v1444_v48, %v1444_v48  ;;  %v1604_v53 = vpack.c.bf16 %v1476_v49, %v1476_v49 }
 0x154   : > { %v1509_v54 = vpack.c.bf16 %v1381_v50, %v1381_v50  ;;  %v1541_v55 = vpack.c.bf16 %v1413_v51, %v1413_v51 }
 0x155   : > { %1701 = vst.msk [vmem:[%s2469_s5 + $0x154] sm:$0xf] %vm1615_vm2, %v1572_v52 }
 0x156   : > { %1733 = vst.msk [vmem:[%s2469_s5 + $0x1d4] sm:$0xf] %vm1615_vm2, %v1604_v53  ;;  %v1126_v56 = vpop.f32.mrf.mxu2  ;;  %v1206_v57 = vpop.f32.mrf.mxu3 }
 0x157   : > { %1638 = vst.msk [vmem:[%s2469_s5 + $0x58] sm:$0xf] %vm1615_vm2, %v1509_v54  ;;  %v1317_v58 = vadd.f32 %v2798_v41, %v1126_v56  ;;  %v1349_v59 = vadd.f32 %v2798_v41, %v1206_v57  ;;  %v968_v60 = vpop.f32.mrf.mxu0  ;;  %v1048_v61 = vpop.f32.mrf.mxu1 }
 0x158   : > { %1670 = vst.msk [vmem:[%s2469_s5 + $0xd8] sm:$0xf] %vm1615_vm2, %v1541_v55  ;;  %v1254_v62 = vadd.f32 %v2798_v41, %v968_v60  ;;  %v1286_v63 = vadd.f32 %v2798_v41, %v1048_v61 }
 0x159   : > { %v1445_v0 = vmax.f32 %v1317_v58, 0.0  ;;  %v1477_v1 = vmax.f32 %v1349_v59, 0.0 }
 0x15a   : > { %v1382_v2 = vmax.f32 %v1254_v62, 0.0  ;;  %v1414_v3 = vmax.f32 %v1286_v63, 0.0 }
 0x15b   : > { %v1573_v4 = vpack.c.bf16 %v1445_v0, %v1445_v0  ;;  %v1605_v5 = vpack.c.bf16 %v1477_v1, %v1477_v1 }
 0x15c   : > { %v1510_v6 = vpack.c.bf16 %v1382_v2, %v1382_v2  ;;  %v1542_v7 = vpack.c.bf16 %v1414_v3, %v1414_v3 }
 0x15d   : > { %1702 = vst.msk [vmem:[%s2469_s5 + $0x158] sm:$0xf] %vm1615_vm2, %v1573_v4 }
 0x15e   : > { %1734 = vst.msk [vmem:[%s2469_s5 + $0x1d8] sm:$0xf] %vm1615_vm2, %v1605_v5  ;;  %v1128_v8 = vpop.f32.mrf.mxu2  ;;  %v1208_v9 = vpop.f32.mrf.mxu3 }
 0x15f   : > { %1639 = vst.msk [vmem:[%s2469_s5 + $0x5c] sm:$0xf] %vm1615_vm2, %v1510_v6  ;;  %v1318_v10 = vadd.f32 %v2798_v41, %v1128_v8  ;;  %v1350_v11 = vadd.f32 %v2798_v41, %v1208_v9  ;;  %v971_v12 = vpop.f32.mrf.mxu0  ;;  %v1051_v13 = vpop.f32.mrf.mxu1 }
 0x160   : > { %1671 = vst.msk [vmem:[%s2469_s5 + $0xdc] sm:$0xf] %vm1615_vm2, %v1542_v7  ;;  %v1255_v14 = vadd.f32 %v2798_v41, %v971_v12  ;;  %v1287_v15 = vadd.f32 %v2798_v41, %v1051_v13 }
 0x161   : > { %v1446_v16 = vmax.f32 %v1318_v10, 0.0  ;;  %v1478_v17 = vmax.f32 %v1350_v11, 0.0 }
 0x162   : > { %v1383_v18 = vmax.f32 %v1255_v14, 0.0  ;;  %v1415_v19 = vmax.f32 %v1287_v15, 0.0 }
 0x163   : > { %v1574_v20 = vpack.c.bf16 %v1446_v16, %v1446_v16  ;;  %v1606_v21 = vpack.c.bf16 %v1478_v17, %v1478_v17 }
 0x164   : > { %v1511_v22 = vpack.c.bf16 %v1383_v18, %v1383_v18  ;;  %v1543_v23 = vpack.c.bf16 %v1415_v19, %v1415_v19 }
 0x165   : > { %1703 = vst.msk [vmem:[%s2469_s5 + $0x15c] sm:$0xf] %vm1615_vm2, %v1574_v20 }
 0x166   : > { %1735 = vst.msk [vmem:[%s2469_s5 + $0x1dc] sm:$0xf] %vm1615_vm2, %v1606_v21  ;;  %v1131_v24 = vpop.f32.mrf.mxu2  ;;  %v1211_v25 = vpop.f32.mrf.mxu3 }
 0x167   : > { %1640 = vst.msk [vmem:[%s2469_s5 + $0x60] sm:$0xf] %vm1615_vm2, %v1511_v22  ;;  %v1319_v26 = vadd.f32 %v2798_v41, %v1131_v24  ;;  %v1351_v27 = vadd.f32 %v2798_v41, %v1211_v25  ;;  %v973_v28 = vpop.f32.mrf.mxu0  ;;  %v1053_v29 = vpop.f32.mrf.mxu1 }
 0x168   : > { %1672 = vst.msk [vmem:[%s2469_s5 + $0xe0] sm:$0xf] %vm1615_vm2, %v1543_v23  ;;  %v1256_v30 = vadd.f32 %v2798_v41, %v973_v28  ;;  %v1288_v31 = vadd.f32 %v2798_v41, %v1053_v29 }
 0x169   : > { %v1447_v32 = vmax.f32 %v1319_v26, 0.0  ;;  %v1479_v33 = vmax.f32 %v1351_v27, 0.0 }
 0x16a   : > { %v1384_v34 = vmax.f32 %v1256_v30, 0.0  ;;  %v1416_v35 = vmax.f32 %v1288_v31, 0.0 }
 0x16b   : > { %v1575_v36 = vpack.c.bf16 %v1447_v32, %v1447_v32  ;;  %v1607_v37 = vpack.c.bf16 %v1479_v33, %v1479_v33 }
 0x16c   : > { %v1512_v38 = vpack.c.bf16 %v1384_v34, %v1384_v34  ;;  %v1544_v39 = vpack.c.bf16 %v1416_v35, %v1416_v35 }
 0x16d   : > { %1704 = vst.msk [vmem:[%s2469_s5 + $0x160] sm:$0xf] %vm1615_vm2, %v1575_v36 }
 0x16e   : > { %1736 = vst.msk [vmem:[%s2469_s5 + $0x1e0] sm:$0xf] %vm1615_vm2, %v1607_v37  ;;  %v1133_v40 = vpop.f32.mrf.mxu2  ;;  %v1213_v42 = vpop.f32.mrf.mxu3 }
 0x16f   : > { %1641 = vst.msk [vmem:[%s2469_s5 + $0x64] sm:$0xf] %vm1615_vm2, %v1512_v38  ;;  %v1320_v43 = vadd.f32 %v2798_v41, %v1133_v40  ;;  %v1352_v44 = vadd.f32 %v2798_v41, %v1213_v42  ;;  %v976_v45 = vpop.f32.mrf.mxu0  ;;  %v1056_v46 = vpop.f32.mrf.mxu1 }
 0x170   : > { %1673 = vst.msk [vmem:[%s2469_s5 + $0xe4] sm:$0xf] %vm1615_vm2, %v1544_v39  ;;  %v1257_v47 = vadd.f32 %v2798_v41, %v976_v45  ;;  %v1289_v48 = vadd.f32 %v2798_v41, %v1056_v46 }
 0x171   : > { %v1448_v49 = vmax.f32 %v1320_v43, 0.0  ;;  %v1480_v50 = vmax.f32 %v1352_v44, 0.0 }
 0x172   : > { %v1385_v51 = vmax.f32 %v1257_v47, 0.0  ;;  %v1417_v52 = vmax.f32 %v1289_v48, 0.0 }
 0x173   : > { %v1576_v53 = vpack.c.bf16 %v1448_v49, %v1448_v49  ;;  %v1608_v54 = vpack.c.bf16 %v1480_v50, %v1480_v50 }
 0x174   : > { %v1513_v55 = vpack.c.bf16 %v1385_v51, %v1385_v51  ;;  %v1545_v56 = vpack.c.bf16 %v1417_v52, %v1417_v52 }
 0x175   : > { %1705 = vst.msk [vmem:[%s2469_s5 + $0x164] sm:$0xf] %vm1615_vm2, %v1576_v53 }
 0x176   : > { %1737 = vst.msk [vmem:[%s2469_s5 + $0x1e4] sm:$0xf] %vm1615_vm2, %v1608_v54  ;;  %v1136_v57 = vpop.f32.mrf.mxu2  ;;  %v1216_v58 = vpop.f32.mrf.mxu3 }
 0x177   : > { %1642 = vst.msk [vmem:[%s2469_s5 + $0x68] sm:$0xf] %vm1615_vm2, %v1513_v55  ;;  %v1321_v59 = vadd.f32 %v2798_v41, %v1136_v57  ;;  %v1353_v60 = vadd.f32 %v2798_v41, %v1216_v58  ;;  %v978_v61 = vpop.f32.mrf.mxu0  ;;  %v1058_v62 = vpop.f32.mrf.mxu1 }
 0x178   : > { %1674 = vst.msk [vmem:[%s2469_s5 + $0xe8] sm:$0xf] %vm1615_vm2, %v1545_v56  ;;  %v1258_v63 = vadd.f32 %v2798_v41, %v978_v61  ;;  %v1290_v0 = vadd.f32 %v2798_v41, %v1058_v62 }
 0x179   : > { %v1449_v1 = vmax.f32 %v1321_v59, 0.0  ;;  %v1481_v2 = vmax.f32 %v1353_v60, 0.0 }
 0x17a   : > { %v1386_v3 = vmax.f32 %v1258_v63, 0.0  ;;  %v1418_v4 = vmax.f32 %v1290_v0, 0.0 }
 0x17b   : > { %v1577_v5 = vpack.c.bf16 %v1449_v1, %v1449_v1  ;;  %v1609_v6 = vpack.c.bf16 %v1481_v2, %v1481_v2 }
 0x17c   : > { %v1514_v7 = vpack.c.bf16 %v1386_v3, %v1386_v3  ;;  %v1546_v8 = vpack.c.bf16 %v1418_v4, %v1418_v4 }
 0x17d   : > { %1706 = vst.msk [vmem:[%s2469_s5 + $0x168] sm:$0xf] %vm1615_vm2, %v1577_v5 }
 0x17e   : > { %1738 = vst.msk [vmem:[%s2469_s5 + $0x1e8] sm:$0xf] %vm1615_vm2, %v1609_v6  ;;  %v1138_v9 = vpop.f32.mrf.mxu2  ;;  %v1218_v10 = vpop.f32.mrf.mxu3 }
 0x17f   : > { %1643 = vst.msk [vmem:[%s2469_s5 + $0x6c] sm:$0xf] %vm1615_vm2, %v1514_v7  ;;  %v1322_v11 = vadd.f32 %v2798_v41, %v1138_v9  ;;  %v1354_v12 = vadd.f32 %v2798_v41, %v1218_v10  ;;  %v981_v13 = vpop.f32.mrf.mxu0  ;;  %v1061_v14 = vpop.f32.mrf.mxu1 }
 0x180   : > { %1675 = vst.msk [vmem:[%s2469_s5 + $0xec] sm:$0xf] %vm1615_vm2, %v1546_v8  ;;  %v1259_v15 = vadd.f32 %v2798_v41, %v981_v13  ;;  %v1291_v16 = vadd.f32 %v2798_v41, %v1061_v14 }
 0x181   : > { %v1450_v17 = vmax.f32 %v1322_v11, 0.0  ;;  %v1482_v18 = vmax.f32 %v1354_v12, 0.0 }
 0x182   : > { %v1387_v19 = vmax.f32 %v1259_v15, 0.0  ;;  %v1419_v20 = vmax.f32 %v1291_v16, 0.0 }
 0x183   : > { %v1578_v21 = vpack.c.bf16 %v1450_v17, %v1450_v17  ;;  %v1610_v22 = vpack.c.bf16 %v1482_v18, %v1482_v18 }
 0x184   : > { %v1515_v23 = vpack.c.bf16 %v1387_v19, %v1387_v19  ;;  %v1547_v24 = vpack.c.bf16 %v1419_v20, %v1419_v20 }
 0x185   : > { %1707 = vst.msk [vmem:[%s2469_s5 + $0x16c] sm:$0xf] %vm1615_vm2, %v1578_v21 }
 0x186   : > { %1739 = vst.msk [vmem:[%s2469_s5 + $0x1ec] sm:$0xf] %vm1615_vm2, %v1610_v22  ;;  %v1141_v25 = vpop.f32.mrf.mxu2  ;;  %v1221_v26 = vpop.f32.mrf.mxu3 }
 0x187   : > { %1644 = vst.msk [vmem:[%s2469_s5 + $0x70] sm:$0xf] %vm1615_vm2, %v1515_v23  ;;  %v1323_v27 = vadd.f32 %v2798_v41, %v1141_v25  ;;  %v1355_v28 = vadd.f32 %v2798_v41, %v1221_v26  ;;  %v983_v29 = vpop.f32.mrf.mxu0  ;;  %v1063_v30 = vpop.f32.mrf.mxu1 }
 0x188   : > { %1676 = vst.msk [vmem:[%s2469_s5 + $0xf0] sm:$0xf] %vm1615_vm2, %v1547_v24  ;;  %v1260_v31 = vadd.f32 %v2798_v41, %v983_v29  ;;  %v1292_v32 = vadd.f32 %v2798_v41, %v1063_v30 }
 0x189   : > { %v1451_v33 = vmax.f32 %v1323_v27, 0.0  ;;  %v1483_v34 = vmax.f32 %v1355_v28, 0.0 }
 0x18a   : > { %v1388_v35 = vmax.f32 %v1260_v31, 0.0  ;;  %v1420_v36 = vmax.f32 %v1292_v32, 0.0 }
 0x18b   : > { %v1579_v37 = vpack.c.bf16 %v1451_v33, %v1451_v33  ;;  %v1611_v38 = vpack.c.bf16 %v1483_v34, %v1483_v34 }
 0x18c   : > { %v1516_v39 = vpack.c.bf16 %v1388_v35, %v1388_v35  ;;  %v1548_v40 = vpack.c.bf16 %v1420_v36, %v1420_v36 }
 0x18d   : > { %1708 = vst.msk [vmem:[%s2469_s5 + $0x170] sm:$0xf] %vm1615_vm2, %v1579_v37 }
 0x18e   : > { %1740 = vst.msk [vmem:[%s2469_s5 + $0x1f0] sm:$0xf] %vm1615_vm2, %v1611_v38  ;;  %v1143_v42 = vpop.f32.mrf.mxu2  ;;  %v1223_v43 = vpop.f32.mrf.mxu3 }
 0x18f   : > { %1645 = vst.msk [vmem:[%s2469_s5 + $0x74] sm:$0xf] %vm1615_vm2, %v1516_v39  ;;  %v1324_v44 = vadd.f32 %v2798_v41, %v1143_v42  ;;  %v1356_v45 = vadd.f32 %v2798_v41, %v1223_v43  ;;  %v986_v46 = vpop.f32.mrf.mxu0  ;;  %v1066_v47 = vpop.f32.mrf.mxu1 }
 0x190   : > { %1677 = vst.msk [vmem:[%s2469_s5 + $0xf4] sm:$0xf] %vm1615_vm2, %v1548_v40  ;;  %v1261_v48 = vadd.f32 %v2798_v41, %v986_v46  ;;  %v1293_v49 = vadd.f32 %v2798_v41, %v1066_v47 }
 0x191   : > { %v1452_v50 = vmax.f32 %v1324_v44, 0.0  ;;  %v1484_v51 = vmax.f32 %v1356_v45, 0.0 }
 0x192   : > { %v1389_v52 = vmax.f32 %v1261_v48, 0.0  ;;  %v1421_v53 = vmax.f32 %v1293_v49, 0.0 }
 0x193   : > { %v1580_v54 = vpack.c.bf16 %v1452_v50, %v1452_v50  ;;  %v1612_v55 = vpack.c.bf16 %v1484_v51, %v1484_v51 }
 0x194   : > { %v1517_v56 = vpack.c.bf16 %v1389_v52, %v1389_v52  ;;  %v1549_v57 = vpack.c.bf16 %v1421_v53, %v1421_v53 }
 0x195   : > { %1709 = vst.msk [vmem:[%s2469_s5 + $0x174] sm:$0xf] %vm1615_vm2, %v1580_v54 }
 0x196   : > { %1741 = vst.msk [vmem:[%s2469_s5 + $0x1f4] sm:$0xf] %vm1615_vm2, %v1612_v55  ;;  %v1146_v58 = vpop.f32.mrf.mxu2  ;;  %v1226_v59 = vpop.f32.mrf.mxu3 }
 0x197   : > { %1646 = vst.msk [vmem:[%s2469_s5 + $0x78] sm:$0xf] %vm1615_vm2, %v1517_v56  ;;  %v1325_v60 = vadd.f32 %v2798_v41, %v1146_v58  ;;  %v1357_v61 = vadd.f32 %v2798_v41, %v1226_v59  ;;  %v988_v62 = vpop.f32.mrf.mxu0  ;;  %v1068_v63 = vpop.f32.mrf.mxu1 }
 0x198   : > { %1678 = vst.msk [vmem:[%s2469_s5 + $0xf8] sm:$0xf] %vm1615_vm2, %v1549_v57  ;;  %v1262_v0 = vadd.f32 %v2798_v41, %v988_v62  ;;  %v1294_v1 = vadd.f32 %v2798_v41, %v1068_v63 }
 0x199   : > { %v1453_v2 = vmax.f32 %v1325_v60, 0.0  ;;  %v1485_v3 = vmax.f32 %v1357_v61, 0.0 }
 0x19a   : > { %v1390_v4 = vmax.f32 %v1262_v0, 0.0  ;;  %v1422_v5 = vmax.f32 %v1294_v1, 0.0 }
 0x19b   : > { %v1581_v6 = vpack.c.bf16 %v1453_v2, %v1453_v2  ;;  %v1613_v7 = vpack.c.bf16 %v1485_v3, %v1485_v3 }
 0x19c   : > { %v1518_v8 = vpack.c.bf16 %v1390_v4, %v1390_v4  ;;  %v1550_v9 = vpack.c.bf16 %v1422_v5, %v1422_v5 }
 0x19d   : > { %1710 = vst.msk [vmem:[%s2469_s5 + $0x178] sm:$0xf] %vm1615_vm2, %v1581_v6 }
 0x19e   : > { %1742 = vst.msk [vmem:[%s2469_s5 + $0x1f8] sm:$0xf] %vm1615_vm2, %v1613_v7  ;;  %v1148_v10 = vpop.f32.mrf.mxu2  ;;  %v1228_v11 = vpop.f32.mrf.mxu3 }
 0x19f   : > { %1647 = vst.msk [vmem:[%s2469_s5 + $0x7c] sm:$0xf] %vm1615_vm2, %v1518_v8  ;;  %v1326_v12 = vadd.f32 %v2798_v41, %v1148_v10  ;;  %v1358_v13 = vadd.f32 %v2798_v41, %v1228_v11 }
 0x1a0   : > { %1679 = vst.msk [vmem:[%s2469_s5 + $0xfc] sm:$0xf] %vm1615_vm2, %v1550_v9 }
 0x1a1   : > { %v1454_v14 = vmax.f32 %v1326_v12, 0.0  ;;  %v1486_v15 = vmax.f32 %v1358_v13, 0.0 }
 0x1a3   : > { %v1582_v16 = vpack.c.bf16 %v1454_v14, %v1454_v14  ;;  %v1614_v17 = vpack.c.bf16 %v1486_v15, %v1486_v15 }
 0x1a5   : > { %1711 = vst.msk [vmem:[%s2469_s5 + $0x17c] sm:$0xf] %vm1615_vm2, %v1582_v16 }
 0x1a6   : > { %1743 = vst.msk [vmem:[%s2469_s5 + $0x1fc] sm:$0xf] %vm1615_vm2, %v1614_v17 }
 0x1a7 PF: > { %s13_s14 = sadd.s32 1, %s2324_s14   ;;  %s2929_s12 = smov %s2320_s13 }
 0x1a8   : > { %p10_p5 = scmp.ge.s32.totalorder %s13_s14, 4   ;;  %s2930_s13 = smov %s2932_s15 }
 0x1aa   :  { %12 = sbr.rel (!%p10_p5) target bundleno = 2 (0x2), region = 68 }

</bundles_post_ra>
